<compile_context>
chip_gen: v6e
topology: v6e:2x2x1
jax: 0.10.0
libtpu: 0.0.40
codegen_flags: <defaults>
</compile_context>

<pallas_src>
import functools

import jax
import jax.numpy as jnp
import numpy as np
from jax import lax
from jax.experimental import pallas as pl
from jax.experimental.pallas import tpu as pltpu


# ---------------------------------------------------------------------------
# helpers
# ---------------------------------------------------------------------------
def _round_up(x, m):
    return ((x + m - 1) // m) * m


def _pick_time_chunk(T, Bb, h3p, max_chunk=64, gi_budget_bytes=4 << 20):
    """Largest divisor of T that is <= max_chunk and whose bf16 gi staging
    buffer (Tc, Bb, 3H) fits a modest VMEM budget."""
    for c in range(min(max_chunk, T), 0, -1):
        if T % c == 0 and c * Bb * h3p * 2 <= gi_budget_bytes:
            return c
    return 1


def _pad_gates(w, rows, rows_pad, H, H_pad):
    """(rows, 3H) GRU weight -> (rows_pad, 3*H_pad), padding per gate block so
    the r/z/n slices stay on 128-lane tile boundaries."""
    w3 = w.reshape(rows, 3, H)
    w3 = jnp.pad(w3, ((0, rows_pad - rows), (0, 0), (0, H_pad - H)))
    return w3.reshape(rows_pad, 3 * H_pad)


# ---------------------------------------------------------------------------
# fused GRU encoder + mean-pool + classifier kernel
# grid = (batch_blocks [parallel], time_chunks [arbitrary / sequential])
# ---------------------------------------------------------------------------
def _gru_cls_kernel(T, Tc, H,
                    x_ref, wih_ref, whh_ref, bih_ref, bhhn_ref,
                    wcls_ref, bcls_ref,
                    tok_out_ref, hlast_ref, logits_ref,
                    h_scratch, acc_scratch, gi_scratch):
    c = pl.program_id(1)
    nc = pl.num_programs(1)
    B = x_ref.shape[1]
    D = x_ref.shape[2]
    H3 = 3 * H

    # Fresh recurrent state at the start of every batch block's time sweep.
    @pl.when(c == 0)
    def _():
        h_scratch[...] = jnp.zeros_like(h_scratch)
        acc_scratch[...] = jnp.zeros_like(acc_scratch)

    # ---- input projection for the whole chunk: ONE large MXU matmul --------
    # (Tc*B, D) x (D, 3H); bf16 operands, f32 accumulation.  b_ih already
    # carries the r/z parts of b_hh (folded at wrapper time).
    x2d = x_ref[...].reshape(Tc * B, D)
    gi = jnp.dot(x2d, wih_ref[...], preferred_element_type=jnp.float32)
    gi = gi + bih_ref[...]                                    # (Tc*B, 3H) f32
    gi_scratch[...] = gi.reshape(Tc, B, H3).astype(jnp.bfloat16)  # bf16 stage

    # Hoisted (loop-invariant) broadcast of the n-gate recurrent bias — no
    # per-step broadcast_in_dim on the serial path.
    bhh_n = jnp.broadcast_to(bhhn_ref[...], (B, H))           # (B, H) f32

    # ---- sequential GRU recurrence (only h @ W_hh per step) ----------------
    def step(t, carry):
        h, acc = carry                                        # (B, H) f32
        gh = jnp.dot(h.astype(jnp.bfloat16), whh_ref[...],
                     preferred_element_type=jnp.float32)      # (B, 3H) f32
        g = gi_scratch[t].astype(jnp.float32)                 # f32 gate math
        r = jax.nn.sigmoid(g[:, 0:H] + gh[:, 0:H])
        z = jax.nn.sigmoid(g[:, H:2 * H] + gh[:, H:2 * H])
        n = jnp.tanh(g[:, 2 * H:H3] + r * (gh[:, 2 * H:H3] + bhh_n))
        h_new = (1.0 - z) * n + z * h
        tok_out_ref[t] = h_new.astype(jnp.bfloat16)           # lane-dense bf16
        return h_new, acc + h_new

    h_f, acc_f = lax.fori_loop(0, Tc, step,
                               (h_scratch[...], acc_scratch[...]),
                               unroll=min(Tc, 8))
    h_scratch[...] = h_f
    acc_scratch[...] = acc_f

    # ---- finalize on the last time chunk only -------------------------------
    @pl.when(c == nc - 1)
    def _():
        hlast_ref[...] = h_f
        # Soft attention over a K==1 text feature reduces exactly to the time
        # mean, so the head is mean_T(h) @ W_cls^T + b_cls.
        text_feature = acc_f * jnp.float32(1.0 / T)           # (B, H) f32
        logits = jnp.dot(text_feature.astype(jnp.bfloat16), wcls_ref[...],
                         preferred_element_type=jnp.float32)  # (B, NL_pad)
        logits_ref[...] = logits + bcls_ref[...]


def gru_encode_classify(x_tbd, w_ih, w_hh, b_ih, b_hh_n, w_cls_t, b_cls,
                        *, time_chunk=None):
    """x_tbd: (T, B_pad, D_pad) bf16, time-major, padded.
    Returns token_output (T,B_pad,H_pad) bf16, last_hidden (B_pad,H_pad) f32,
    logits (B_pad, NL_pad) f32."""
    T, Bp, Dp = x_tbd.shape
    H3p = w_ih.shape[1]
    Hp = H3p // 3
    NLp = w_cls_t.shape[1]

    # Batch-parallel axis: only split when the batch is genuinely large enough
    # that both halves keep a >=16-row (bf16 sublane tile) recurrent matmul.
    # Splitting a tiny batch only shrinks M of the serial h@W_hh matmul without
    # gaining any parallelism.
    Bb = Bp // 2 if (Bp >= 32 and Bp % 32 == 0) else Bp
    nb = Bp // Bb

    Tc = time_chunk if time_chunk is not None else _pick_time_chunk(T, Bb, H3p)
    nc = T // Tc

    kernel = functools.partial(_gru_cls_kernel, T, Tc, Hp)
    grid_spec = pltpu.PrefetchScalarGridSpec(
        num_scalar_prefetch=0,
        grid=(nb, nc),
        in_specs=[
            pl.BlockSpec((Tc, Bb, Dp), lambda b, c: (c, b, 0)),   # x chunk
            pl.BlockSpec((Dp, H3p), lambda b, c: (0, 0)),         # W_ih (resident)
            pl.BlockSpec((Hp, H3p), lambda b, c: (0, 0)),         # W_hh (resident)
            pl.BlockSpec((1, H3p), lambda b, c: (0, 0)),          # b_ih (+ rz b_hh)
            pl.BlockSpec((1, Hp), lambda b, c: (0, 0)),           # b_hh n-gate only
            pl.BlockSpec((Hp, NLp), lambda b, c: (0, 0)),         # W_cls^T
            pl.BlockSpec((1, NLp), lambda b, c: (0, 0)),          # b_cls
        ],
        out_specs=[
            pl.BlockSpec((Tc, Bb, Hp), lambda b, c: (c, b, 0)),   # token_output
            pl.BlockSpec((Bb, Hp), lambda b, c: (b, 0)),          # last_hidden
            pl.BlockSpec((Bb, NLp), lambda b, c: (b, 0)),         # logits
        ],
        scratch_shapes=[
            pltpu.VMEM((Bb, Hp), jnp.float32),                    # h state
            pltpu.VMEM((Bb, Hp), jnp.float32),                    # running sum of h
            pltpu.VMEM((Tc, Bb, H3p), jnp.bfloat16),              # staged gi (bf16)
        ],
    )

    # Explicit VMEM budget so the same tiling compiles on v7x (64 MiB VMEM,
    # smaller default scoped limit) as well as v5e/v6e.
    weight_bytes = (Dp * H3p + Hp * H3p + Hp * NLp) * 2 + (H3p + Hp + NLp) * 4
    chunk_bytes = Tc * Bb * (Dp + Hp) * 2
    scratch_bytes = 2 * Bb * Hp * 4 + Tc * Bb * H3p * 2
    small_out_bytes = Bb * (Hp + NLp) * 4
    vmem_est = 2 * (weight_bytes + chunk_bytes + small_out_bytes) + scratch_bytes
    vmem_limit = int(min(max(3 * vmem_est, 16 * 1024 * 1024), 48 * 1024 * 1024))

    return pl.pallas_call(
        kernel,
        grid_spec=grid_spec,
        out_shape=[
            jax.ShapeDtypeStruct((T, Bp, Hp), jnp.bfloat16),      # bf16 writeback
            jax.ShapeDtypeStruct((Bp, Hp), jnp.float32),
            jax.ShapeDtypeStruct((Bp, NLp), jnp.float32),
        ],
        compiler_params=pltpu.CompilerParams(
            dimension_semantics=("parallel", "arbitrary"),
            vmem_limit_bytes=vmem_limit),
    )(x_tbd, w_ih, w_hh, b_ih, b_hh_n, w_cls_t, b_cls)


# ---------------------------------------------------------------------------
# parameter construction + forward glue
# ---------------------------------------------------------------------------
def init_params(key, vocab_size, embed_dim, hidden_dim, num_labels):
    ks = jax.random.split(key, 8)
    s = 0.1
    return {
        "token_emb": s * jax.random.normal(ks[0], (vocab_size, embed_dim), jnp.float32),
        # label_emb is kept for fidelity with the module but is provably unused:
        # the soft attention over a size-1 K axis cancels it out exactly.
        "label_emb": s * jax.random.normal(ks[1], (num_labels, hidden_dim), jnp.float32),
        "w_ih": s * jax.random.normal(ks[2], (embed_dim, 3 * hidden_dim), jnp.float32),
        "w_hh": s * jax.random.normal(ks[3], (hidden_dim, 3 * hidden_dim), jnp.float32),
        "b_ih": s * jax.random.normal(ks[4], (1, 3 * hidden_dim), jnp.float32),
        "b_hh": s * jax.random.normal(ks[5], (1, 3 * hidden_dim), jnp.float32),
        "w_cls": s * jax.random.normal(ks[6], (num_labels, hidden_dim), jnp.float32),
        "b_cls": s * jax.random.normal(ks[7], (1, num_labels), jnp.float32),
    }


@jax.jit
def jpave_forward(params, tokens):
    """tokens: (B, T) int32. Returns (value_cls_logits, token_output, last_hidden)."""
    B, T = tokens.shape
    V, D = params["token_emb"].shape
    H = params["w_hh"].shape[0]
    NL = params["w_cls"].shape[0]

    Dp = _round_up(D, 128)
    Hp = _round_up(H, 128)
    NLp = _round_up(NL, 128)
    # Batch padded to the bf16 packed-sublane tile (16) so the in-kernel
    # (Tc,Bb,D)->(Tc*Bb,D) flatten is a pure relayout no-op.
    # TODO(synk): padding to 8 would halve the waste at tiny B but turns the
    #             flatten into a packed-sublane shuffle.
    Bp = _round_up(B, 16)

    # Embedding gather directly in time-major order; bf16 activations.
    x_tbd = params["token_emb"][tokens.T].astype(jnp.bfloat16)     # (T, B, D)
    x_tbd = jnp.pad(x_tbd, ((0, 0), (0, Bp - B), (0, Dp - D)))

    # GRU weights: gate-wise 128-lane padding; bf16 weights, f32 biases.
    w_ih = _pad_gates(params["w_ih"], D, Dp, H, Hp).astype(jnp.bfloat16)
    w_hh = _pad_gates(params["w_hh"], H, Hp, H, Hp).astype(jnp.bfloat16)

    # Fold the r/z parts of b_hh into b_ih (exact: those gates are
    # sigmoid(gi + gh) with both biases simply added); only the n-gate
    # recurrent bias must stay inside the r-multiplied term.
    b_ih3 = params["b_ih"].reshape(1, 3, H)
    b_hh3 = params["b_hh"].reshape(1, 3, H)
    b_ih_eff = b_ih3 + jnp.concatenate(
        [b_hh3[:, 0:2, :], jnp.zeros_like(b_hh3[:, 2:3, :])], axis=1)
    b_ih_k = jnp.pad(b_ih_eff, ((0, 0), (0, 0), (0, Hp - H))).reshape(1, 3 * Hp)
    b_hh_n = jnp.pad(b_hh3[:, 2, :], ((0, 0), (0, Hp - H)))        # (1, Hp)

    # Classifier: torch Linear weight (NL, H) -> (Hp, NLp) so the logits store
    # is lane-dense; bf16 weight, f32 bias.
    w_cls_t = jnp.pad(params["w_cls"].T,
                      ((0, Hp - H), (0, NLp - NL))).astype(jnp.bfloat16)
    b_cls = jnp.pad(params["b_cls"], ((0, 0), (0, NLp - NL)))

    tok_out, last_hidden, logits = gru_encode_classify(
        x_tbd, w_ih, w_hh, b_ih_k, b_hh_n, w_cls_t, b_cls)

    # token_output kept in bf16 downstream (halves the transpose HBM traffic);
    # at production sizes prefer keeping the time-major layout end-to-end.
    token_output = jnp.transpose(tok_out[:, :B, :H], (1, 0, 2))    # (B, T, H) bf16
    last_hidden = last_hidden[:B, :H]
    value_cls_logits = logits[:B, :NL]
    return value_cls_logits, token_output, last_hidden


# ---------------------------------------------------------------------------
# pure-JAX f32 reference of the modeled part of JPAVE.forward (for validation)
# ---------------------------------------------------------------------------
def _reference_forward(params, tokens):
    H = params["w_hh"].shape[0]
    x = params["token_emb"][tokens]                            # (B, T, D) f32

    def cell(h, x_t):
        gi = x_t @ params["w_ih"] + params["b_ih"][0]
        gh = h @ params["w_hh"] + params["b_hh"][0]
        r = jax.nn.sigmoid(gi[:, :H] + gh[:, :H])
        z = jax.nn.sigmoid(gi[:, H:2 * H] + gh[:, H:2 * H])
        n = jnp.tanh(gi[:, 2 * H:] + r * gh[:, 2 * H:])
        h_new = (1.0 - z) * n + z * h
        return h_new, h_new

    h0 = jnp.zeros((tokens.shape[0], H), jnp.float32)
    h_last, hs = lax.scan(cell, h0, jnp.transpose(x, (1, 0, 2)))
    token_output = jnp.transpose(hs, (1, 0, 2))                # (B, T, H)
    # Soft attention with a size-1 K axis is the identity on the time mean.
    text_feature = token_output.mean(axis=1)
    logits = text_feature @ params["w_cls"].T + params["b_cls"][0]
    return logits, token_output, h_last


if __name__ == "__main__":
    B, T, V, D, H, NUM_LABELS = 2, 8, 50, 128, 128, 6
    key = jax.random.PRNGKey(0)
    pkey, tkey = jax.random.split(key)
    params = init_params(pkey, V, D, H, NUM_LABELS)
    tokens = jax.random.randint(tkey, (B, T), 0, V, dtype=jnp.int32)

    logits, token_output, last_hidden = jpave_forward(params, tokens)
    jax.block_until_ready((logits, token_output, last_hidden))

    assert logits.shape == (B, NUM_LABELS)
    assert token_output.shape == (B, T, H)
    assert last_hidden.shape == (B, H)

    ref_logits, ref_tok, ref_h = _reference_forward(params, tokens)
    np.testing.assert_allclose(np.asarray(logits, dtype=np.float32),
                               np.asarray(ref_logits, dtype=np.float32),
                               atol=3e-2, rtol=3e-2)
    np.testing.assert_allclose(np.asarray(last_hidden, dtype=np.float32),
                               np.asarray(ref_h, dtype=np.float32),
                               atol=3e-2, rtol=3e-2)
    np.testing.assert_allclose(np.asarray(token_output.astype(jnp.float32)),
                               np.asarray(ref_tok, dtype=np.float32),
                               atol=3e-2, rtol=3e-2)

    print("KERNEL_OK")
</pallas_src>

<mosaic_0001>
module attributes {stable_mosaic.version = 11 : i64} {
  func.func @_gru_cls_kernel(%arg0: i32, %arg1: i32, %arg2: memref<8x16x128xbf16, #tpu.memory_space<vmem>>, %arg3: memref<128x384xbf16, #tpu.memory_space<vmem>>, %arg4: memref<128x384xbf16, #tpu.memory_space<vmem>>, %arg5: memref<1x384xf32, #tpu.memory_space<vmem>>, %arg6: memref<1x128xf32, #tpu.memory_space<vmem>>, %arg7: memref<128x128xbf16, #tpu.memory_space<vmem>>, %arg8: memref<1x128xf32, #tpu.memory_space<vmem>>, %arg9: memref<8x16x128xbf16, #tpu.memory_space<vmem>>, %arg10: memref<16x128xf32, #tpu.memory_space<vmem>>, %arg11: memref<16x128xf32, #tpu.memory_space<vmem>>, %arg12: memref<16x128xf32, #tpu.memory_space<vmem>>, %arg13: memref<16x128xf32, #tpu.memory_space<vmem>>, %arg14: memref<8x16x384xbf16, #tpu.memory_space<vmem>>) attributes {dimension_semantics = [#tpu.dimension_semantics<parallel>, #tpu.dimension_semantics<arbitrary>], iteration_bounds = array<i64: 1, 1>, scalar_prefetch = 0 : i64, scratch_operands = 3 : i64, tpu.core_type = #tpu.core_type<tc>, window_params = [{transform_indices = @transform_0, window_bounds = array<i64: 8, 16, 128>}, {pipeline_mode = #tpu.pipeline_mode<synchronous>, transform_indices = @transform_1, window_bounds = array<i64: 128, 384>}, {pipeline_mode = #tpu.pipeline_mode<synchronous>, transform_indices = @transform_2, window_bounds = array<i64: 128, 384>}, {pipeline_mode = #tpu.pipeline_mode<synchronous>, transform_indices = @transform_3, window_bounds = array<i64: 1, 384>}, {pipeline_mode = #tpu.pipeline_mode<synchronous>, transform_indices = @transform_4, window_bounds = array<i64: 1, 128>}, {pipeline_mode = #tpu.pipeline_mode<synchronous>, transform_indices = @transform_5, window_bounds = array<i64: 128, 128>}, {pipeline_mode = #tpu.pipeline_mode<synchronous>, transform_indices = @transform_6, window_bounds = array<i64: 1, 128>}, {transform_indices = @transform_7, window_bounds = array<i64: 8, 16, 128>}, {transform_indices = @transform_8, window_bounds = array<i64: 16, 128>}, {transform_indices = @transform_9, window_bounds = array<i64: 16, 128>}]} {
    %c0_i32 = arith.constant 0 : i32
    %0 = arith.cmpi eq, %arg1, %c0_i32 : i32
    %1 = arith.extui %0 : i1 to i32
    %c0_i32_0 = arith.constant 0 : i32
    %2 = arith.cmpi ne, %1, %c0_i32_0 : i32
    scf.if %2 {
      %cst_103 = arith.constant 0.000000e+00 : f32
      %343 = vector.broadcast %cst_103 : f32 to vector<16x128xf32>
      %c0_104 = arith.constant 0 : index
      %c0_105 = arith.constant 0 : index
      %344 = vector.load %arg12[%c0_104, %c0_105] : memref<16x128xf32, #tpu.memory_space<vmem>>, vector<16x128xf32>
      tpu.vector_store %arg12[%c0_104, %c0_105], %343 {strides = array<i32>} : memref<16x128xf32, #tpu.memory_space<vmem>>, vector<16x128xf32>,
      %cst_106 = arith.constant 0.000000e+00 : f32
      %345 = vector.broadcast %cst_106 : f32 to vector<16x128xf32>
      %c0_107 = arith.constant 0 : index
      %c0_108 = arith.constant 0 : index
      %346 = vector.load %arg13[%c0_107, %c0_108] : memref<16x128xf32, #tpu.memory_space<vmem>>, vector<16x128xf32>
      tpu.vector_store %arg13[%c0_107, %c0_108], %345 {strides = array<i32>} : memref<16x128xf32, #tpu.memory_space<vmem>>, vector<16x128xf32>,
    } else {
    }
    %c0 = arith.constant 0 : index
    %c0_1 = arith.constant 0 : index
    %c0_2 = arith.constant 0 : index
    %3 = vector.load %arg2[%c0, %c0_1, %c0_2] : memref<8x16x128xbf16, #tpu.memory_space<vmem>>, vector<8x16x128xbf16>
    %4 = vector.shape_cast %3 : vector<8x16x128xbf16> to vector<128x128xbf16>
    %c0_3 = arith.constant 0 : index
    %c0_4 = arith.constant 0 : index
    %5 = vector.load %arg3[%c0_3, %c0_4] : memref<128x384xbf16, #tpu.memory_space<vmem>>, vector<128x384xbf16>
    %cst = arith.constant dense<0.000000e+00> : vector<128x384xf32>
    %6 = tpu.matmul %4, %5, %cst {dimension_numbers = #tpu.dot_dimension_numbers<[1], [0], [0], [1], [0, 0, 1, 1], [], []>} : vector<128x128xbf16>, vector<128x384xbf16>, vector<128x384xf32> -> vector<128x384xf32>
    %c0_5 = arith.constant 0 : index
    %c0_6 = arith.constant 0 : index
    %7 = vector.load %arg5[%c0_5, %c0_6] : memref<1x384xf32, #tpu.memory_space<vmem>>, vector<1x384xf32>
    %8 = vector.broadcast %7 : vector<1x384xf32> to vector<128x384xf32>
    %9 = arith.addf %6, %8 : vector<128x384xf32>
    %10 = vector.shape_cast %9 : vector<128x384xf32> to vector<8x16x384xf32>
    %11 = arith.truncf %10 : vector<8x16x384xf32> to vector<8x16x384xbf16>
    %c0_7 = arith.constant 0 : index
    %c0_8 = arith.constant 0 : index
    %c0_9 = arith.constant 0 : index
    %12 = vector.load %arg14[%c0_7, %c0_8, %c0_9] : memref<8x16x384xbf16, #tpu.memory_space<vmem>>, vector<8x16x384xbf16>
    tpu.vector_store %arg14[%c0_7, %c0_8, %c0_9], %11 {strides = array<i32>} : memref<8x16x384xbf16, #tpu.memory_space<vmem>>, vector<8x16x384xbf16>,
    %c0_10 = arith.constant 0 : index
    %c0_11 = arith.constant 0 : index
    %13 = vector.load %arg6[%c0_10, %c0_11] : memref<1x128xf32, #tpu.memory_space<vmem>>, vector<1x128xf32>
    %14 = vector.shape_cast %13 : vector<1x128xf32> to vector<1x128xf32>
    %15 = vector.broadcast %14 : vector<1x128xf32> to vector<16x128xf32>
    %c0_12 = arith.constant 0 : index
    %c0_13 = arith.constant 0 : index
    %16 = vector.load %arg12[%c0_12, %c0_13] : memref<16x128xf32, #tpu.memory_space<vmem>>, vector<16x128xf32>
    %c0_14 = arith.constant 0 : index
    %c0_15 = arith.constant 0 : index
    %17 = vector.load %arg13[%c0_14, %c0_15] : memref<16x128xf32, #tpu.memory_space<vmem>>, vector<16x128xf32>
    %c0_i32_16 = arith.constant 0 : i32
    %18 = arith.truncf %16 : vector<16x128xf32> to vector<16x128xbf16>
    %c0_17 = arith.constant 0 : index
    %c0_18 = arith.constant 0 : index
    %19 = vector.load %arg4[%c0_17, %c0_18] : memref<128x384xbf16, #tpu.memory_space<vmem>>, vector<128x384xbf16>
    %cst_19 = arith.constant dense<0.000000e+00> : vector<16x384xf32>
    %20 = tpu.matmul %18, %19, %cst_19 {dimension_numbers = #tpu.dot_dimension_numbers<[1], [0], [0], [1], [0, 0, 1, 1], [], []>} : vector<16x128xbf16>, vector<128x384xbf16>, vector<16x384xf32> -> vector<16x384xf32>
    %21 = arith.index_cast %c0_i32_16 : i32 to index
    %c0_20 = arith.constant 0 : index
    %c0_21 = arith.constant 0 : index
    %22 = vector.load %arg14[%21, %c0_20, %c0_21] : memref<8x16x384xbf16, #tpu.memory_space<vmem>>, vector<1x16x384xbf16>
    %23 = vector.shape_cast %22 : vector<1x16x384xbf16> to vector<16x384xbf16>
    %24 = arith.extf %23 : vector<16x384xbf16> to vector<16x384xf32>
    %25 = vector.extract_strided_slice %24 {offsets = [0, 0], sizes = [16, 128], strides = [1, 1]} : vector<16x384xf32> to vector<16x128xf32>
    %26 = vector.extract_strided_slice %20 {offsets = [0, 0], sizes = [16, 128], strides = [1, 1]} : vector<16x384xf32> to vector<16x128xf32>
    %27 = arith.addf %25, %26 : vector<16x128xf32>
    %28 = arith.negf %27 : vector<16x128xf32>
    %29 = math.exp %28 : vector<16x128xf32>
    %cst_22 = arith.constant 1.000000e+00 : f32
    %30 = vector.broadcast %cst_22 : f32 to vector<16x128xf32>
    %31 = arith.addf %30, %29 : vector<16x128xf32>
    %32 = arith.divf %30, %31 : vector<16x128xf32>
    %33 = vector.extract_strided_slice %24 {offsets = [0, 128], sizes = [16, 128], strides = [1, 1]} : vector<16x384xf32> to vector<16x128xf32>
    %34 = vector.extract_strided_slice %20 {offsets = [0, 128], sizes = [16, 128], strides = [1, 1]} : vector<16x384xf32> to vector<16x128xf32>
    %35 = arith.addf %33, %34 : vector<16x128xf32>
    %36 = arith.negf %35 : vector<16x128xf32>
    %37 = math.exp %36 : vector<16x128xf32>
    %cst_23 = arith.constant 1.000000e+00 : f32
    %38 = vector.broadcast %cst_23 : f32 to vector<16x128xf32>
    %39 = arith.addf %38, %37 : vector<16x128xf32>
    %40 = arith.divf %38, %39 : vector<16x128xf32>
    %41 = vector.extract_strided_slice %24 {offsets = [0, 256], sizes = [16, 128], strides = [1, 1]} : vector<16x384xf32> to vector<16x128xf32>
    %42 = vector.extract_strided_slice %20 {offsets = [0, 256], sizes = [16, 128], strides = [1, 1]} : vector<16x384xf32> to vector<16x128xf32>
    %43 = arith.addf %42, %15 : vector<16x128xf32>
    %44 = arith.mulf %32, %43 : vector<16x128xf32>
    %45 = arith.addf %41, %44 : vector<16x128xf32>
    %46 = math.tanh %45 : vector<16x128xf32>
    %cst_24 = arith.constant 1.000000e+00 : f32
    %47 = vector.broadcast %cst_24 : f32 to vector<16x128xf32>
    %48 = arith.subf %47, %40 : vector<16x128xf32>
    %49 = arith.mulf %48, %46 : vector<16x128xf32>
    %50 = arith.mulf %40, %16 : vector<16x128xf32>
    %51 = arith.addf %49, %50 : vector<16x128xf32>
    %52 = arith.truncf %51 : vector<16x128xf32> to vector<16x128xbf16>
    %53 = arith.index_cast %c0_i32_16 : i32 to index
    %c0_25 = arith.constant 0 : index
    %c0_26 = arith.constant 0 : index
    %54 = vector.load %arg9[%53, %c0_25, %c0_26] : memref<8x16x128xbf16, #tpu.memory_space<vmem>>, vector<1x16x128xbf16>
    %55 = vector.shape_cast %54 : vector<1x16x128xbf16> to vector<16x128xbf16>
    %56 = vector.shape_cast %52 : vector<16x128xbf16> to vector<1x16x128xbf16>
    tpu.vector_store %arg9[%53, %c0_25, %c0_26], %56 {strides = array<i32>} : memref<8x16x128xbf16, #tpu.memory_space<vmem>>, vector<1x16x128xbf16>,
    %57 = arith.addf %17, %51 : vector<16x128xf32>
    %c1_i32 = arith.constant 1 : i32
    %58 = arith.truncf %51 : vector<16x128xf32> to vector<16x128xbf16>
    %c0_27 = arith.constant 0 : index
    %c0_28 = arith.constant 0 : index
    %59 = vector.load %arg4[%c0_27, %c0_28] : memref<128x384xbf16, #tpu.memory_space<vmem>>, vector<128x384xbf16>
    %cst_29 = arith.constant dense<0.000000e+00> : vector<16x384xf32>
    %60 = tpu.matmul %58, %59, %cst_29 {dimension_numbers = #tpu.dot_dimension_numbers<[1], [0], [0], [1], [0, 0, 1, 1], [], []>} : vector<16x128xbf16>, vector<128x384xbf16>, vector<16x384xf32> -> vector<16x384xf32>
    %61 = arith.index_cast %c1_i32 : i32 to index
    %c0_30 = arith.constant 0 : index
    %c0_31 = arith.constant 0 : index
    %62 = vector.load %arg14[%61, %c0_30, %c0_31] : memref<8x16x384xbf16, #tpu.memory_space<vmem>>, vector<1x16x384xbf16>
    %63 = vector.shape_cast %62 : vector<1x16x384xbf16> to vector<16x384xbf16>
    %64 = arith.extf %63 : vector<16x384xbf16> to vector<16x384xf32>
    %65 = vector.extract_strided_slice %64 {offsets = [0, 0], sizes = [16, 128], strides = [1, 1]} : vector<16x384xf32> to vector<16x128xf32>
    %66 = vector.extract_strided_slice %60 {offsets = [0, 0], sizes = [16, 128], strides = [1, 1]} : vector<16x384xf32> to vector<16x128xf32>
    %67 = arith.addf %65, %66 : vector<16x128xf32>
    %68 = arith.negf %67 : vector<16x128xf32>
    %69 = math.exp %68 : vector<16x128xf32>
    %cst_32 = arith.constant 1.000000e+00 : f32
    %70 = vector.broadcast %cst_32 : f32 to vector<16x128xf32>
    %71 = arith.addf %70, %69 : vector<16x128xf32>
    %72 = arith.divf %70, %71 : vector<16x128xf32>
    %73 = vector.extract_strided_slice %64 {offsets = [0, 128], sizes = [16, 128], strides = [1, 1]} : vector<16x384xf32> to vector<16x128xf32>
    %74 = vector.extract_strided_slice %60 {offsets = [0, 128], sizes = [16, 128], strides = [1, 1]} : vector<16x384xf32> to vector<16x128xf32>
    %75 = arith.addf %73, %74 : vector<16x128xf32>
    %76 = arith.negf %75 : vector<16x128xf32>
    %77 = math.exp %76 : vector<16x128xf32>
    %cst_33 = arith.constant 1.000000e+00 : f32
    %78 = vector.broadcast %cst_33 : f32 to vector<16x128xf32>
    %79 = arith.addf %78, %77 : vector<16x128xf32>
    %80 = arith.divf %78, %79 : vector<16x128xf32>
    %81 = vector.extract_strided_slice %64 {offsets = [0, 256], sizes = [16, 128], strides = [1, 1]} : vector<16x384xf32> to vector<16x128xf32>
    %82 = vector.extract_strided_slice %60 {offsets = [0, 256], sizes = [16, 128], strides = [1, 1]} : vector<16x384xf32> to vector<16x128xf32>
    %83 = arith.addf %82, %15 : vector<16x128xf32>
    %84 = arith.mulf %72, %83 : vector<16x128xf32>
    %85 = arith.addf %81, %84 : vector<16x128xf32>
    %86 = math.tanh %85 : vector<16x128xf32>
    %cst_34 = arith.constant 1.000000e+00 : f32
    %87 = vector.broadcast %cst_34 : f32 to vector<16x128xf32>
    %88 = arith.subf %87, %80 : vector<16x128xf32>
    %89 = arith.mulf %88, %86 : vector<16x128xf32>
    %90 = arith.mulf %80, %51 : vector<16x128xf32>
    %91 = arith.addf %89, %90 : vector<16x128xf32>
    %92 = arith.truncf %91 : vector<16x128xf32> to vector<16x128xbf16>
    %93 = arith.index_cast %c1_i32 : i32 to index
    %c0_35 = arith.constant 0 : index
    %c0_36 = arith.constant 0 : index
    %94 = vector.load %arg9[%93, %c0_35, %c0_36] : memref<8x16x128xbf16, #tpu.memory_space<vmem>>, vector<1x16x128xbf16>
    %95 = vector.shape_cast %94 : vector<1x16x128xbf16> to vector<16x128xbf16>
    %96 = vector.shape_cast %92 : vector<16x128xbf16> to vector<1x16x128xbf16>
    tpu.vector_store %arg9[%93, %c0_35, %c0_36], %96 {strides = array<i32>} : memref<8x16x128xbf16, #tpu.memory_space<vmem>>, vector<1x16x128xbf16>,
    %97 = arith.addf %57, %91 : vector<16x128xf32>
    %c2_i32 = arith.constant 2 : i32
    %98 = arith.truncf %91 : vector<16x128xf32> to vector<16x128xbf16>
    %c0_37 = arith.constant 0 : index
    %c0_38 = arith.constant 0 : index
    %99 = vector.load %arg4[%c0_37, %c0_38] : memref<128x384xbf16, #tpu.memory_space<vmem>>, vector<128x384xbf16>
    %cst_39 = arith.constant dense<0.000000e+00> : vector<16x384xf32>
    %100 = tpu.matmul %98, %99, %cst_39 {dimension_numbers = #tpu.dot_dimension_numbers<[1], [0], [0], [1], [0, 0, 1, 1], [], []>} : vector<16x128xbf16>, vector<128x384xbf16>, vector<16x384xf32> -> vector<16x384xf32>
    %101 = arith.index_cast %c2_i32 : i32 to index
    %c0_40 = arith.constant 0 : index
    %c0_41 = arith.constant 0 : index
    %102 = vector.load %arg14[%101, %c0_40, %c0_41] : memref<8x16x384xbf16, #tpu.memory_space<vmem>>, vector<1x16x384xbf16>
    %103 = vector.shape_cast %102 : vector<1x16x384xbf16> to vector<16x384xbf16>
    %104 = arith.extf %103 : vector<16x384xbf16> to vector<16x384xf32>
    %105 = vector.extract_strided_slice %104 {offsets = [0, 0], sizes = [16, 128], strides = [1, 1]} : vector<16x384xf32> to vector<16x128xf32>
    %106 = vector.extract_strided_slice %100 {offsets = [0, 0], sizes = [16, 128], strides = [1, 1]} : vector<16x384xf32> to vector<16x128xf32>
    %107 = arith.addf %105, %106 : vector<16x128xf32>
    %108 = arith.negf %107 : vector<16x128xf32>
    %109 = math.exp %108 : vector<16x128xf32>
    %cst_42 = arith.constant 1.000000e+00 : f32
    %110 = vector.broadcast %cst_42 : f32 to vector<16x128xf32>
    %111 = arith.addf %110, %109 : vector<16x128xf32>
    %112 = arith.divf %110, %111 : vector<16x128xf32>
    %113 = vector.extract_strided_slice %104 {offsets = [0, 128], sizes = [16, 128], strides = [1, 1]} : vector<16x384xf32> to vector<16x128xf32>
    %114 = vector.extract_strided_slice %100 {offsets = [0, 128], sizes = [16, 128], strides = [1, 1]} : vector<16x384xf32> to vector<16x128xf32>
    %115 = arith.addf %113, %114 : vector<16x128xf32>
    %116 = arith.negf %115 : vector<16x128xf32>
    %117 = math.exp %116 : vector<16x128xf32>
    %cst_43 = arith.constant 1.000000e+00 : f32
    %118 = vector.broadcast %cst_43 : f32 to vector<16x128xf32>
    %119 = arith.addf %118, %117 : vector<16x128xf32>
    %120 = arith.divf %118, %119 : vector<16x128xf32>
    %121 = vector.extract_strided_slice %104 {offsets = [0, 256], sizes = [16, 128], strides = [1, 1]} : vector<16x384xf32> to vector<16x128xf32>
    %122 = vector.extract_strided_slice %100 {offsets = [0, 256], sizes = [16, 128], strides = [1, 1]} : vector<16x384xf32> to vector<16x128xf32>
    %123 = arith.addf %122, %15 : vector<16x128xf32>
    %124 = arith.mulf %112, %123 : vector<16x128xf32>
    %125 = arith.addf %121, %124 : vector<16x128xf32>
    %126 = math.tanh %125 : vector<16x128xf32>
    %cst_44 = arith.constant 1.000000e+00 : f32
    %127 = vector.broadcast %cst_44 : f32 to vector<16x128xf32>
    %128 = arith.subf %127, %120 : vector<16x128xf32>
    %129 = arith.mulf %128, %126 : vector<16x128xf32>
    %130 = arith.mulf %120, %91 : vector<16x128xf32>
    %131 = arith.addf %129, %130 : vector<16x128xf32>
    %132 = arith.truncf %131 : vector<16x128xf32> to vector<16x128xbf16>
    %133 = arith.index_cast %c2_i32 : i32 to index
    %c0_45 = arith.constant 0 : index
    %c0_46 = arith.constant 0 : index
    %134 = vector.load %arg9[%133, %c0_45, %c0_46] : memref<8x16x128xbf16, #tpu.memory_space<vmem>>, vector<1x16x128xbf16>
    %135 = vector.shape_cast %134 : vector<1x16x128xbf16> to vector<16x128xbf16>
    %136 = vector.shape_cast %132 : vector<16x128xbf16> to vector<1x16x128xbf16>
    tpu.vector_store %arg9[%133, %c0_45, %c0_46], %136 {strides = array<i32>} : memref<8x16x128xbf16, #tpu.memory_space<vmem>>, vector<1x16x128xbf16>,
    %137 = arith.addf %97, %131 : vector<16x128xf32>
    %c3_i32 = arith.constant 3 : i32
    %138 = arith.truncf %131 : vector<16x128xf32> to vector<16x128xbf16>
    %c0_47 = arith.constant 0 : index
    %c0_48 = arith.constant 0 : index
    %139 = vector.load %arg4[%c0_47, %c0_48] : memref<128x384xbf16, #tpu.memory_space<vmem>>, vector<128x384xbf16>
    %cst_49 = arith.constant dense<0.000000e+00> : vector<16x384xf32>
    %140 = tpu.matmul %138, %139, %cst_49 {dimension_numbers = #tpu.dot_dimension_numbers<[1], [0], [0], [1], [0, 0, 1, 1], [], []>} : vector<16x128xbf16>, vector<128x384xbf16>, vector<16x384xf32> -> vector<16x384xf32>
    %141 = arith.index_cast %c3_i32 : i32 to index
    %c0_50 = arith.constant 0 : index
    %c0_51 = arith.constant 0 : index
    %142 = vector.load %arg14[%141, %c0_50, %c0_51] : memref<8x16x384xbf16, #tpu.memory_space<vmem>>, vector<1x16x384xbf16>
    %143 = vector.shape_cast %142 : vector<1x16x384xbf16> to vector<16x384xbf16>
    %144 = arith.extf %143 : vector<16x384xbf16> to vector<16x384xf32>
    %145 = vector.extract_strided_slice %144 {offsets = [0, 0], sizes = [16, 128], strides = [1, 1]} : vector<16x384xf32> to vector<16x128xf32>
    %146 = vector.extract_strided_slice %140 {offsets = [0, 0], sizes = [16, 128], strides = [1, 1]} : vector<16x384xf32> to vector<16x128xf32>
    %147 = arith.addf %145, %146 : vector<16x128xf32>
    %148 = arith.negf %147 : vector<16x128xf32>
    %149 = math.exp %148 : vector<16x128xf32>
    %cst_52 = arith.constant 1.000000e+00 : f32
    %150 = vector.broadcast %cst_52 : f32 to vector<16x128xf32>
    %151 = arith.addf %150, %149 : vector<16x128xf32>
    %152 = arith.divf %150, %151 : vector<16x128xf32>
    %153 = vector.extract_strided_slice %144 {offsets = [0, 128], sizes = [16, 128], strides = [1, 1]} : vector<16x384xf32> to vector<16x128xf32>
    %154 = vector.extract_strided_slice %140 {offsets = [0, 128], sizes = [16, 128], strides = [1, 1]} : vector<16x384xf32> to vector<16x128xf32>
    %155 = arith.addf %153, %154 : vector<16x128xf32>
    %156 = arith.negf %155 : vector<16x128xf32>
    %157 = math.exp %156 : vector<16x128xf32>
    %cst_53 = arith.constant 1.000000e+00 : f32
    %158 = vector.broadcast %cst_53 : f32 to vector<16x128xf32>
    %159 = arith.addf %158, %157 : vector<16x128xf32>
    %160 = arith.divf %158, %159 : vector<16x128xf32>
    %161 = vector.extract_strided_slice %144 {offsets = [0, 256], sizes = [16, 128], strides = [1, 1]} : vector<16x384xf32> to vector<16x128xf32>
    %162 = vector.extract_strided_slice %140 {offsets = [0, 256], sizes = [16, 128], strides = [1, 1]} : vector<16x384xf32> to vector<16x128xf32>
    %163 = arith.addf %162, %15 : vector<16x128xf32>
    %164 = arith.mulf %152, %163 : vector<16x128xf32>
    %165 = arith.addf %161, %164 : vector<16x128xf32>
    %166 = math.tanh %165 : vector<16x128xf32>
    %cst_54 = arith.constant 1.000000e+00 : f32
    %167 = vector.broadcast %cst_54 : f32 to vector<16x128xf32>
    %168 = arith.subf %167, %160 : vector<16x128xf32>
    %169 = arith.mulf %168, %166 : vector<16x128xf32>
    %170 = arith.mulf %160, %131 : vector<16x128xf32>
    %171 = arith.addf %169, %170 : vector<16x128xf32>
    %172 = arith.truncf %171 : vector<16x128xf32> to vector<16x128xbf16>
    %173 = arith.index_cast %c3_i32 : i32 to index
    %c0_55 = arith.constant 0 : index
    %c0_56 = arith.constant 0 : index
    %174 = vector.load %arg9[%173, %c0_55, %c0_56] : memref<8x16x128xbf16, #tpu.memory_space<vmem>>, vector<1x16x128xbf16>
    %175 = vector.shape_cast %174 : vector<1x16x128xbf16> to vector<16x128xbf16>
    %176 = vector.shape_cast %172 : vector<16x128xbf16> to vector<1x16x128xbf16>
    tpu.vector_store %arg9[%173, %c0_55, %c0_56], %176 {strides = array<i32>} : memref<8x16x128xbf16, #tpu.memory_space<vmem>>, vector<1x16x128xbf16>,
    %177 = arith.addf %137, %171 : vector<16x128xf32>
    %c4_i32 = arith.constant 4 : i32
    %178 = arith.truncf %171 : vector<16x128xf32> to vector<16x128xbf16>
    %c0_57 = arith.constant 0 : index
    %c0_58 = arith.constant 0 : index
    %179 = vector.load %arg4[%c0_57, %c0_58] : memref<128x384xbf16, #tpu.memory_space<vmem>>, vector<128x384xbf16>
    %cst_59 = arith.constant dense<0.000000e+00> : vector<16x384xf32>
    %180 = tpu.matmul %178, %179, %cst_59 {dimension_numbers = #tpu.dot_dimension_numbers<[1], [0], [0], [1], [0, 0, 1, 1], [], []>} : vector<16x128xbf16>, vector<128x384xbf16>, vector<16x384xf32> -> vector<16x384xf32>
    %181 = arith.index_cast %c4_i32 : i32 to index
    %c0_60 = arith.constant 0 : index
    %c0_61 = arith.constant 0 : index
    %182 = vector.load %arg14[%181, %c0_60, %c0_61] : memref<8x16x384xbf16, #tpu.memory_space<vmem>>, vector<1x16x384xbf16>
    %183 = vector.shape_cast %182 : vector<1x16x384xbf16> to vector<16x384xbf16>
    %184 = arith.extf %183 : vector<16x384xbf16> to vector<16x384xf32>
    %185 = vector.extract_strided_slice %184 {offsets = [0, 0], sizes = [16, 128], strides = [1, 1]} : vector<16x384xf32> to vector<16x128xf32>
    %186 = vector.extract_strided_slice %180 {offsets = [0, 0], sizes = [16, 128], strides = [1, 1]} : vector<16x384xf32> to vector<16x128xf32>
    %187 = arith.addf %185, %186 : vector<16x128xf32>
    %188 = arith.negf %187 : vector<16x128xf32>
    %189 = math.exp %188 : vector<16x128xf32>
    %cst_62 = arith.constant 1.000000e+00 : f32
    %190 = vector.broadcast %cst_62 : f32 to vector<16x128xf32>
    %191 = arith.addf %190, %189 : vector<16x128xf32>
    %192 = arith.divf %190, %191 : vector<16x128xf32>
    %193 = vector.extract_strided_slice %184 {offsets = [0, 128], sizes = [16, 128], strides = [1, 1]} : vector<16x384xf32> to vector<16x128xf32>
    %194 = vector.extract_strided_slice %180 {offsets = [0, 128], sizes = [16, 128], strides = [1, 1]} : vector<16x384xf32> to vector<16x128xf32>
    %195 = arith.addf %193, %194 : vector<16x128xf32>
    %196 = arith.negf %195 : vector<16x128xf32>
    %197 = math.exp %196 : vector<16x128xf32>
    %cst_63 = arith.constant 1.000000e+00 : f32
    %198 = vector.broadcast %cst_63 : f32 to vector<16x128xf32>
    %199 = arith.addf %198, %197 : vector<16x128xf32>
    %200 = arith.divf %198, %199 : vector<16x128xf32>
    %201 = vector.extract_strided_slice %184 {offsets = [0, 256], sizes = [16, 128], strides = [1, 1]} : vector<16x384xf32> to vector<16x128xf32>
    %202 = vector.extract_strided_slice %180 {offsets = [0, 256], sizes = [16, 128], strides = [1, 1]} : vector<16x384xf32> to vector<16x128xf32>
    %203 = arith.addf %202, %15 : vector<16x128xf32>
    %204 = arith.mulf %192, %203 : vector<16x128xf32>
    %205 = arith.addf %201, %204 : vector<16x128xf32>
    %206 = math.tanh %205 : vector<16x128xf32>
    %cst_64 = arith.constant 1.000000e+00 : f32
    %207 = vector.broadcast %cst_64 : f32 to vector<16x128xf32>
    %208 = arith.subf %207, %200 : vector<16x128xf32>
    %209 = arith.mulf %208, %206 : vector<16x128xf32>
    %210 = arith.mulf %200, %171 : vector<16x128xf32>
    %211 = arith.addf %209, %210 : vector<16x128xf32>
    %212 = arith.truncf %211 : vector<16x128xf32> to vector<16x128xbf16>
    %213 = arith.index_cast %c4_i32 : i32 to index
    %c0_65 = arith.constant 0 : index
    %c0_66 = arith.constant 0 : index
    %214 = vector.load %arg9[%213, %c0_65, %c0_66] : memref<8x16x128xbf16, #tpu.memory_space<vmem>>, vector<1x16x128xbf16>
    %215 = vector.shape_cast %214 : vector<1x16x128xbf16> to vector<16x128xbf16>
    %216 = vector.shape_cast %212 : vector<16x128xbf16> to vector<1x16x128xbf16>
    tpu.vector_store %arg9[%213, %c0_65, %c0_66], %216 {strides = array<i32>} : memref<8x16x128xbf16, #tpu.memory_space<vmem>>, vector<1x16x128xbf16>,
    %217 = arith.addf %177, %211 : vector<16x128xf32>
    %c5_i32 = arith.constant 5 : i32
    %218 = arith.truncf %211 : vector<16x128xf32> to vector<16x128xbf16>
    %c0_67 = arith.constant 0 : index
    %c0_68 = arith.constant 0 : index
    %219 = vector.load %arg4[%c0_67, %c0_68] : memref<128x384xbf16, #tpu.memory_space<vmem>>, vector<128x384xbf16>
    %cst_69 = arith.constant dense<0.000000e+00> : vector<16x384xf32>
    %220 = tpu.matmul %218, %219, %cst_69 {dimension_numbers = #tpu.dot_dimension_numbers<[1], [0], [0], [1], [0, 0, 1, 1], [], []>} : vector<16x128xbf16>, vector<128x384xbf16>, vector<16x384xf32> -> vector<16x384xf32>
    %221 = arith.index_cast %c5_i32 : i32 to index
    %c0_70 = arith.constant 0 : index
    %c0_71 = arith.constant 0 : index
    %222 = vector.load %arg14[%221, %c0_70, %c0_71] : memref<8x16x384xbf16, #tpu.memory_space<vmem>>, vector<1x16x384xbf16>
    %223 = vector.shape_cast %222 : vector<1x16x384xbf16> to vector<16x384xbf16>
    %224 = arith.extf %223 : vector<16x384xbf16> to vector<16x384xf32>
    %225 = vector.extract_strided_slice %224 {offsets = [0, 0], sizes = [16, 128], strides = [1, 1]} : vector<16x384xf32> to vector<16x128xf32>
    %226 = vector.extract_strided_slice %220 {offsets = [0, 0], sizes = [16, 128], strides = [1, 1]} : vector<16x384xf32> to vector<16x128xf32>
    %227 = arith.addf %225, %226 : vector<16x128xf32>
    %228 = arith.negf %227 : vector<16x128xf32>
    %229 = math.exp %228 : vector<16x128xf32>
    %cst_72 = arith.constant 1.000000e+00 : f32
    %230 = vector.broadcast %cst_72 : f32 to vector<16x128xf32>
    %231 = arith.addf %230, %229 : vector<16x128xf32>
    %232 = arith.divf %230, %231 : vector<16x128xf32>
    %233 = vector.extract_strided_slice %224 {offsets = [0, 128], sizes = [16, 128], strides = [1, 1]} : vector<16x384xf32> to vector<16x128xf32>
    %234 = vector.extract_strided_slice %220 {offsets = [0, 128], sizes = [16, 128], strides = [1, 1]} : vector<16x384xf32> to vector<16x128xf32>
    %235 = arith.addf %233, %234 : vector<16x128xf32>
    %236 = arith.negf %235 : vector<16x128xf32>
    %237 = math.exp %236 : vector<16x128xf32>
    %cst_73 = arith.constant 1.000000e+00 : f32
    %238 = vector.broadcast %cst_73 : f32 to vector<16x128xf32>
    %239 = arith.addf %238, %237 : vector<16x128xf32>
    %240 = arith.divf %238, %239 : vector<16x128xf32>
    %241 = vector.extract_strided_slice %224 {offsets = [0, 256], sizes = [16, 128], strides = [1, 1]} : vector<16x384xf32> to vector<16x128xf32>
    %242 = vector.extract_strided_slice %220 {offsets = [0, 256], sizes = [16, 128], strides = [1, 1]} : vector<16x384xf32> to vector<16x128xf32>
    %243 = arith.addf %242, %15 : vector<16x128xf32>
    %244 = arith.mulf %232, %243 : vector<16x128xf32>
    %245 = arith.addf %241, %244 : vector<16x128xf32>
    %246 = math.tanh %245 : vector<16x128xf32>
    %cst_74 = arith.constant 1.000000e+00 : f32
    %247 = vector.broadcast %cst_74 : f32 to vector<16x128xf32>
    %248 = arith.subf %247, %240 : vector<16x128xf32>
    %249 = arith.mulf %248, %246 : vector<16x128xf32>
    %250 = arith.mulf %240, %211 : vector<16x128xf32>
    %251 = arith.addf %249, %250 : vector<16x128xf32>
    %252 = arith.truncf %251 : vector<16x128xf32> to vector<16x128xbf16>
    %253 = arith.index_cast %c5_i32 : i32 to index
    %c0_75 = arith.constant 0 : index
    %c0_76 = arith.constant 0 : index
    %254 = vector.load %arg9[%253, %c0_75, %c0_76] : memref<8x16x128xbf16, #tpu.memory_space<vmem>>, vector<1x16x128xbf16>
    %255 = vector.shape_cast %254 : vector<1x16x128xbf16> to vector<16x128xbf16>
    %256 = vector.shape_cast %252 : vector<16x128xbf16> to vector<1x16x128xbf16>
    tpu.vector_store %arg9[%253, %c0_75, %c0_76], %256 {strides = array<i32>} : memref<8x16x128xbf16, #tpu.memory_space<vmem>>, vector<1x16x128xbf16>,
    %257 = arith.addf %217, %251 : vector<16x128xf32>
    %c6_i32 = arith.constant 6 : i32
    %258 = arith.truncf %251 : vector<16x128xf32> to vector<16x128xbf16>
    %c0_77 = arith.constant 0 : index
    %c0_78 = arith.constant 0 : index
    %259 = vector.load %arg4[%c0_77, %c0_78] : memref<128x384xbf16, #tpu.memory_space<vmem>>, vector<128x384xbf16>
    %cst_79 = arith.constant dense<0.000000e+00> : vector<16x384xf32>
    %260 = tpu.matmul %258, %259, %cst_79 {dimension_numbers = #tpu.dot_dimension_numbers<[1], [0], [0], [1], [0, 0, 1, 1], [], []>} : vector<16x128xbf16>, vector<128x384xbf16>, vector<16x384xf32> -> vector<16x384xf32>
    %261 = arith.index_cast %c6_i32 : i32 to index
    %c0_80 = arith.constant 0 : index
    %c0_81 = arith.constant 0 : index
    %262 = vector.load %arg14[%261, %c0_80, %c0_81] : memref<8x16x384xbf16, #tpu.memory_space<vmem>>, vector<1x16x384xbf16>
    %263 = vector.shape_cast %262 : vector<1x16x384xbf16> to vector<16x384xbf16>
    %264 = arith.extf %263 : vector<16x384xbf16> to vector<16x384xf32>
    %265 = vector.extract_strided_slice %264 {offsets = [0, 0], sizes = [16, 128], strides = [1, 1]} : vector<16x384xf32> to vector<16x128xf32>
    %266 = vector.extract_strided_slice %260 {offsets = [0, 0], sizes = [16, 128], strides = [1, 1]} : vector<16x384xf32> to vector<16x128xf32>
    %267 = arith.addf %265, %266 : vector<16x128xf32>
    %268 = arith.negf %267 : vector<16x128xf32>
    %269 = math.exp %268 : vector<16x128xf32>
    %cst_82 = arith.constant 1.000000e+00 : f32
    %270 = vector.broadcast %cst_82 : f32 to vector<16x128xf32>
    %271 = arith.addf %270, %269 : vector<16x128xf32>
    %272 = arith.divf %270, %271 : vector<16x128xf32>
    %273 = vector.extract_strided_slice %264 {offsets = [0, 128], sizes = [16, 128], strides = [1, 1]} : vector<16x384xf32> to vector<16x128xf32>
    %274 = vector.extract_strided_slice %260 {offsets = [0, 128], sizes = [16, 128], strides = [1, 1]} : vector<16x384xf32> to vector<16x128xf32>
    %275 = arith.addf %273, %274 : vector<16x128xf32>
    %276 = arith.negf %275 : vector<16x128xf32>
    %277 = math.exp %276 : vector<16x128xf32>
    %cst_83 = arith.constant 1.000000e+00 : f32
    %278 = vector.broadcast %cst_83 : f32 to vector<16x128xf32>
    %279 = arith.addf %278, %277 : vector<16x128xf32>
    %280 = arith.divf %278, %279 : vector<16x128xf32>
    %281 = vector.extract_strided_slice %264 {offsets = [0, 256], sizes = [16, 128], strides = [1, 1]} : vector<16x384xf32> to vector<16x128xf32>
    %282 = vector.extract_strided_slice %260 {offsets = [0, 256], sizes = [16, 128], strides = [1, 1]} : vector<16x384xf32> to vector<16x128xf32>
    %283 = arith.addf %282, %15 : vector<16x128xf32>
    %284 = arith.mulf %272, %283 : vector<16x128xf32>
    %285 = arith.addf %281, %284 : vector<16x128xf32>
    %286 = math.tanh %285 : vector<16x128xf32>
    %cst_84 = arith.constant 1.000000e+00 : f32
    %287 = vector.broadcast %cst_84 : f32 to vector<16x128xf32>
    %288 = arith.subf %287, %280 : vector<16x128xf32>
    %289 = arith.mulf %288, %286 : vector<16x128xf32>
    %290 = arith.mulf %280, %251 : vector<16x128xf32>
    %291 = arith.addf %289, %290 : vector<16x128xf32>
    %292 = arith.truncf %291 : vector<16x128xf32> to vector<16x128xbf16>
    %293 = arith.index_cast %c6_i32 : i32 to index
    %c0_85 = arith.constant 0 : index
    %c0_86 = arith.constant 0 : index
    %294 = vector.load %arg9[%293, %c0_85, %c0_86] : memref<8x16x128xbf16, #tpu.memory_space<vmem>>, vector<1x16x128xbf16>
    %295 = vector.shape_cast %294 : vector<1x16x128xbf16> to vector<16x128xbf16>
    %296 = vector.shape_cast %292 : vector<16x128xbf16> to vector<1x16x128xbf16>
    tpu.vector_store %arg9[%293, %c0_85, %c0_86], %296 {strides = array<i32>} : memref<8x16x128xbf16, #tpu.memory_space<vmem>>, vector<1x16x128xbf16>,
    %297 = arith.addf %257, %291 : vector<16x128xf32>
    %c7_i32 = arith.constant 7 : i32
    %298 = arith.truncf %291 : vector<16x128xf32> to vector<16x128xbf16>
    %c0_87 = arith.constant 0 : index
    %c0_88 = arith.constant 0 : index
    %299 = vector.load %arg4[%c0_87, %c0_88] : memref<128x384xbf16, #tpu.memory_space<vmem>>, vector<128x384xbf16>
    %cst_89 = arith.constant dense<0.000000e+00> : vector<16x384xf32>
    %300 = tpu.matmul %298, %299, %cst_89 {dimension_numbers = #tpu.dot_dimension_numbers<[1], [0], [0], [1], [0, 0, 1, 1], [], []>} : vector<16x128xbf16>, vector<128x384xbf16>, vector<16x384xf32> -> vector<16x384xf32>
    %301 = arith.index_cast %c7_i32 : i32 to index
    %c0_90 = arith.constant 0 : index
    %c0_91 = arith.constant 0 : index
    %302 = vector.load %arg14[%301, %c0_90, %c0_91] : memref<8x16x384xbf16, #tpu.memory_space<vmem>>, vector<1x16x384xbf16>
    %303 = vector.shape_cast %302 : vector<1x16x384xbf16> to vector<16x384xbf16>
    %304 = arith.extf %303 : vector<16x384xbf16> to vector<16x384xf32>
    %305 = vector.extract_strided_slice %304 {offsets = [0, 0], sizes = [16, 128], strides = [1, 1]} : vector<16x384xf32> to vector<16x128xf32>
    %306 = vector.extract_strided_slice %300 {offsets = [0, 0], sizes = [16, 128], strides = [1, 1]} : vector<16x384xf32> to vector<16x128xf32>
    %307 = arith.addf %305, %306 : vector<16x128xf32>
    %308 = arith.negf %307 : vector<16x128xf32>
    %309 = math.exp %308 : vector<16x128xf32>
    %cst_92 = arith.constant 1.000000e+00 : f32
    %310 = vector.broadcast %cst_92 : f32 to vector<16x128xf32>
    %311 = arith.addf %310, %309 : vector<16x128xf32>
    %312 = arith.divf %310, %311 : vector<16x128xf32>
    %313 = vector.extract_strided_slice %304 {offsets = [0, 128], sizes = [16, 128], strides = [1, 1]} : vector<16x384xf32> to vector<16x128xf32>
    %314 = vector.extract_strided_slice %300 {offsets = [0, 128], sizes = [16, 128], strides = [1, 1]} : vector<16x384xf32> to vector<16x128xf32>
    %315 = arith.addf %313, %314 : vector<16x128xf32>
    %316 = arith.negf %315 : vector<16x128xf32>
    %317 = math.exp %316 : vector<16x128xf32>
    %cst_93 = arith.constant 1.000000e+00 : f32
    %318 = vector.broadcast %cst_93 : f32 to vector<16x128xf32>
    %319 = arith.addf %318, %317 : vector<16x128xf32>
    %320 = arith.divf %318, %319 : vector<16x128xf32>
    %321 = vector.extract_strided_slice %304 {offsets = [0, 256], sizes = [16, 128], strides = [1, 1]} : vector<16x384xf32> to vector<16x128xf32>
    %322 = vector.extract_strided_slice %300 {offsets = [0, 256], sizes = [16, 128], strides = [1, 1]} : vector<16x384xf32> to vector<16x128xf32>
    %323 = arith.addf %322, %15 : vector<16x128xf32>
    %324 = arith.mulf %312, %323 : vector<16x128xf32>
    %325 = arith.addf %321, %324 : vector<16x128xf32>
    %326 = math.tanh %325 : vector<16x128xf32>
    %cst_94 = arith.constant 1.000000e+00 : f32
    %327 = vector.broadcast %cst_94 : f32 to vector<16x128xf32>
    %328 = arith.subf %327, %320 : vector<16x128xf32>
    %329 = arith.mulf %328, %326 : vector<16x128xf32>
    %330 = arith.mulf %320, %291 : vector<16x128xf32>
    %331 = arith.addf %329, %330 : vector<16x128xf32>
    %332 = arith.truncf %331 : vector<16x128xf32> to vector<16x128xbf16>
    %333 = arith.index_cast %c7_i32 : i32 to index
    %c0_95 = arith.constant 0 : index
    %c0_96 = arith.constant 0 : index
    %334 = vector.load %arg9[%333, %c0_95, %c0_96] : memref<8x16x128xbf16, #tpu.memory_space<vmem>>, vector<1x16x128xbf16>
    %335 = vector.shape_cast %334 : vector<1x16x128xbf16> to vector<16x128xbf16>
    %336 = vector.shape_cast %332 : vector<16x128xbf16> to vector<1x16x128xbf16>
    tpu.vector_store %arg9[%333, %c0_95, %c0_96], %336 {strides = array<i32>} : memref<8x16x128xbf16, #tpu.memory_space<vmem>>, vector<1x16x128xbf16>,
    %337 = arith.addf %297, %331 : vector<16x128xf32>
    %c8_i32 = arith.constant 8 : i32
    %c0_97 = arith.constant 0 : index
    %c0_98 = arith.constant 0 : index
    %338 = vector.load %arg12[%c0_97, %c0_98] : memref<16x128xf32, #tpu.memory_space<vmem>>, vector<16x128xf32>
    tpu.vector_store %arg12[%c0_97, %c0_98], %331 {strides = array<i32>} : memref<16x128xf32, #tpu.memory_space<vmem>>, vector<16x128xf32>,
    %c0_99 = arith.constant 0 : index
    %c0_100 = arith.constant 0 : index
    %339 = vector.load %arg13[%c0_99, %c0_100] : memref<16x128xf32, #tpu.memory_space<vmem>>, vector<16x128xf32>
    tpu.vector_store %arg13[%c0_99, %c0_100], %337 {strides = array<i32>} : memref<16x128xf32, #tpu.memory_space<vmem>>, vector<16x128xf32>,
    %c0_i32_101 = arith.constant 0 : i32
    %340 = arith.cmpi eq, %arg1, %c0_i32_101 : i32
    %341 = arith.extui %340 : i1 to i32
    %c0_i32_102 = arith.constant 0 : i32
    %342 = arith.cmpi ne, %341, %c0_i32_102 : i32
    scf.if %342 {
      %c0_103 = arith.constant 0 : index
      %c0_104 = arith.constant 0 : index
      %343 = vector.load %arg10[%c0_103, %c0_104] : memref<16x128xf32, #tpu.memory_space<vmem>>, vector<16x128xf32>
      tpu.vector_store %arg10[%c0_103, %c0_104], %331 {strides = array<i32>} : memref<16x128xf32, #tpu.memory_space<vmem>>, vector<16x128xf32>,
      %cst_105 = arith.constant 1.250000e-01 : f32
      %344 = vector.broadcast %cst_105 : f32 to vector<16x128xf32>
      %345 = arith.mulf %337, %344 : vector<16x128xf32>
      %346 = arith.truncf %345 : vector<16x128xf32> to vector<16x128xbf16>
      %c0_106 = arith.constant 0 : index
      %c0_107 = arith.constant 0 : index
      %347 = vector.load %arg7[%c0_106, %c0_107] : memref<128x128xbf16, #tpu.memory_space<vmem>>, vector<128x128xbf16>
      %cst_108 = arith.constant dense<0.000000e+00> : vector<16x128xf32>
      %348 = tpu.matmul %346, %347, %cst_108 {dimension_numbers = #tpu.dot_dimension_numbers<[1], [0], [0], [1], [0, 0, 1, 1], [], []>} : vector<16x128xbf16>, vector<128x128xbf16>, vector<16x128xf32> -> vector<16x128xf32>
      %c0_109 = arith.constant 0 : index
      %c0_110 = arith.constant 0 : index
      %349 = vector.load %arg8[%c0_109, %c0_110] : memref<1x128xf32, #tpu.memory_space<vmem>>, vector<1x128xf32>
      %350 = vector.broadcast %349 : vector<1x128xf32> to vector<16x128xf32>
      %351 = arith.addf %348, %350 : vector<16x128xf32>
      %c0_111 = arith.constant 0 : index
      %c0_112 = arith.constant 0 : index
      %352 = vector.load %arg11[%c0_111, %c0_112] : memref<16x128xf32, #tpu.memory_space<vmem>>, vector<16x128xf32>
      tpu.vector_store %arg11[%c0_111, %c0_112], %351 {strides = array<i32>} : memref<16x128xf32, #tpu.memory_space<vmem>>, vector<16x128xf32>,
    } else {
    }
    return
  }
  func.func @transform_0(%arg0: i32, %arg1: i32) -> (i32, i32, i32) {
    %c0_i32 = arith.constant 0 : i32
    %c0_i32_0 = arith.constant 0 : i32
    return %arg1, %arg0, %c0_i32 : i32, i32, i32
  }
  func.func @transform_1(%arg0: i32, %arg1: i32) -> (i32, i32) {
    %c0_i32 = arith.constant 0 : i32
    %c0_i32_0 = arith.constant 0 : i32
    %c0_i32_1 = arith.constant 0 : i32
    return %c0_i32, %c0_i32_0 : i32, i32
  }
  func.func @transform_2(%arg0: i32, %arg1: i32) -> (i32, i32) {
    %c0_i32 = arith.constant 0 : i32
    %c0_i32_0 = arith.constant 0 : i32
    %c0_i32_1 = arith.constant 0 : i32
    return %c0_i32, %c0_i32_0 : i32, i32
  }
  func.func @transform_3(%arg0: i32, %arg1: i32) -> (i32, i32) {
    %c0_i32 = arith.constant 0 : i32
    %c0_i32_0 = arith.constant 0 : i32
    %c0_i32_1 = arith.constant 0 : i32
    return %c0_i32, %c0_i32_0 : i32, i32
  }
  func.func @transform_4(%arg0: i32, %arg1: i32) -> (i32, i32) {
    %c0_i32 = arith.constant 0 : i32
    %c0_i32_0 = arith.constant 0 : i32
    %c0_i32_1 = arith.constant 0 : i32
    return %c0_i32, %c0_i32_0 : i32, i32
  }
  func.func @transform_5(%arg0: i32, %arg1: i32) -> (i32, i32) {
    %c0_i32 = arith.constant 0 : i32
    %c0_i32_0 = arith.constant 0 : i32
    %c0_i32_1 = arith.constant 0 : i32
    return %c0_i32, %c0_i32_0 : i32, i32
  }
  func.func @transform_6(%arg0: i32, %arg1: i32) -> (i32, i32) {
    %c0_i32 = arith.constant 0 : i32
    %c0_i32_0 = arith.constant 0 : i32
    %c0_i32_1 = arith.constant 0 : i32
    return %c0_i32, %c0_i32_0 : i32, i32
  }
  func.func @transform_7(%arg0: i32, %arg1: i32) -> (i32, i32, i32) {
    %c0_i32 = arith.constant 0 : i32
    %c0_i32_0 = arith.constant 0 : i32
    return %arg1, %arg0, %c0_i32 : i32, i32, i32
  }
  func.func @transform_8(%arg0: i32, %arg1: i32) -> (i32, i32) {
    %c0_i32 = arith.constant 0 : i32
    %c0_i32_0 = arith.constant 0 : i32
    return %arg0, %c0_i32 : i32, i32
  }
  func.func @transform_9(%arg0: i32, %arg1: i32) -> (i32, i32) {
    %c0_i32 = arith.constant 0 : i32
    %c0_i32_0 = arith.constant 0 : i32
    return %arg0, %c0_i32 : i32, i32
  }
}

</mosaic_0001>

<bundles_post_ra>
// kernel: jpave_forward.1
= control target key start
LH: loop header
LB: loop body
LE: loop exit
PB: predicated region body
PF: predicated region fallthrough
CT: control target
= control target key end

     0   :  { %v4411_v1 = vmov 0   ;;  %v4412_v30 = vmov 0.0   ;;  %v4413_v58 = vmov 0.0|0.0   ;;  %vm4414_vm0 = vmmov 0   ;;  %s5429_s1 = inlined_call_operand.vmem [shape: bf16[128,384], index: 1, kind: input, shape index: {}]   ;;  %s5430_s0 = inlined_call_operand.vmem [shape: bf16[8,16,128], index: 0, kind: input, shape index: {}]   ;;  %s5431_s2 = inlined_call_operand.vmem [shape: bf16[128,384], index: 2, kind: input, shape index: {}]   ;;  %s5432_s3 = inlined_call_operand.vmem [shape: f32[1,384], index: 3, kind: input, shape index: {}]   ;;  %s5433_s4 = inlined_call_operand.vmem [shape: f32[1,128], index: 4, kind: input, shape index: {}]   ;;  %s5434_s7 = inlined_call_operand.vmem [shape: bf16[8,16,128], index: 7, kind: output, shape index: {0}]   ;;  %s5435_s5 = inlined_call_operand.vmem [shape: bf16[128,128], index: 5, kind: input, shape index: {}]   ;;  %s5436_s8 = inlined_call_operand.vmem [shape: f32[16,128], index: 8, kind: output, shape index: {1}]   ;;  %s5437_s6 = inlined_call_operand.vmem [shape: f32[1,128], index: 6, kind: input, shape index: {}]   ;;  %s5438_s9 = inlined_call_operand.vmem [shape: f32[16,128], index: 9, kind: output, shape index: {2}]  }
   0x1   :  { %v4061_v0 = vld [vmem:[%s5429_s1 + $0xac] ss:$12 sps:$4 sm:$0xff]   ;;  %311 = vmatprep.mubr.bf16.mxu0 %v4411_v1  ;;  %v4063_v2 = vld [vmem:[%s5429_s1 + $0xb0] ss:$12 sps:$4 sm:$0xff]   ;;  %v4064_v3 = vld [vmem:[%s5429_s1 + $0xa8] ss:$12 sps:$4 sm:$0xff]  }
   0x2   :  { %279 = vmatprep.subr.bf16.mxu0 %v4061_v0  ;;  %3845 = vmatprep.subr.bf16.mxu1 %v4063_v2  ;;  %v4065_v4 = vld [vmem:[%s5429_s1 + $0x94] ss:$12 sps:$4 sm:$0xff]   ;;  %v4067_v5 = vld [vmem:[%s5429_s1 + $0x98] ss:$12 sps:$4 sm:$0xff]   ;;  %v4068_v6 = vld [vmem:[%s5429_s1 + $0x90] ss:$12 sps:$4 sm:$0xff]  }
   0x3   :  { %280 = vmatpush1.bf16.msra.mxu0 %v4064_v3  ;;  %3846 = vmatpush3.bf16.msra.mxu1 %v4063_v2  ;;  %v4069_v7 = vld [vmem:[%s5429_s1 + $0x7c] ss:$12 sps:$4 sm:$0xff]   ;;  %v4071_v8 = vld [vmem:[%s5429_s1 + $0x80] ss:$12 sps:$4 sm:$0xff]   ;;  %v4072_v9 = vld [vmem:[%s5429_s1 + $0x78] ss:$12 sps:$4 sm:$0xff]  }
   0x4   :  { %281 = vmatprep.subr.bf16.mxu0 %v4065_v4  ;;  %3847 = vmatprep.subr.bf16.mxu1 %v4067_v5  ;;  %v4073_v10 = vld [vmem:[%s5429_s1 + $0x64] ss:$12 sps:$4 sm:$0xff]   ;;  %v4075_v11 = vld [vmem:[%s5429_s1 + $0x68] ss:$12 sps:$4 sm:$0xff]   ;;  %v4076_v12 = vld [vmem:[%s5429_s1 + $0x60] ss:$12 sps:$4 sm:$0xff]   ;;  %v88_v4 = vlaneseq }
   0x5   :  { %v4077_v13 = vld [vmem:[%s5429_s1 + $0x4c] ss:$12 sps:$4 sm:$0xff]   ;;  %v4079_v14 = vld [vmem:[%s5429_s1 + $0x50] ss:$12 sps:$4 sm:$0xff]   ;;  %v4080_v15 = vld [vmem:[%s5429_s1 + $0x48] ss:$12 sps:$4 sm:$0xff]  }
   0x6   :  { %v4081_v16 = vld [vmem:[%s5429_s1 + $0x34] ss:$12 sps:$4 sm:$0xff]   ;;  %v4083_v17 = vld [vmem:[%s5429_s1 + $0x38] ss:$12 sps:$4 sm:$0xff]   ;;  %v4084_v19 = vld [vmem:[%s5429_s1 + $0x30] ss:$12 sps:$4 sm:$0xff]  }
   0x7   :  { %282 = vmatpush1.bf16.msra.mxu0 %v4068_v6  ;;  %3848 = vmatpush3.bf16.msra.mxu1 %v4067_v5  ;;  %v4093_v18 = vld [vmem:[%s5430_s0] sm:$0xff]   ;;  %v4085_v20 = vld [vmem:[%s5429_s1 + $0x1c] ss:$12 sps:$4 sm:$0xff]   ;;  %v4544_v26 = vld [vmem:[%s5431_s2 + $0xac] ss:$12 sps:$4 sm:$0xff]   ;;  %v89_v5 = vshrl.u32 %v88_v4, 7 }
   0x8   :  { %283 = vmatprep.subr.bf16.mxu0 %v4069_v7  ;;  %3849 = vmatprep.subr.bf16.mxu1 %v4071_v8  ;;  %v4087_v21 = vld [vmem:[%s5429_s1 + $0x20] ss:$12 sps:$4 sm:$0xff]   ;;  %v4088_v22 = vld [vmem:[%s5429_s1 + $0x18] ss:$12 sps:$4 sm:$0xff]   ;;  %v4091_v24 = vld [vmem:[%s5429_s1 + $0x8] ss:$12 sps:$4 sm:$0xff]  }
   0x9   :  { %3861 = vmatprep.mubr.bf16.mxu1 %v4093_v18  ;;  %v4089_v23 = vld [vmem:[%s5429_s1 + $0x4] ss:$12 sps:$4 sm:$0xff]   ;;  %v4092_v25 = vld [vmem:[%s5429_s1] ss:$12 sps:$4 sm:$0xff]   ;;  %v4552_v28 = vld [vmem:[%s5431_s2 + $0xa8] ss:$12 sps:$4 sm:$0xff]  }
   0xa   :  { %v4094_v27 = vld [vmem:[%s5430_s0 + $0x8] sm:$0xff]   ;;  %v4098_v29 = vld [vmem:[%s5431_s2 + $0xb0] ss:$12 sps:$4 sm:$0xff]   ;;  %v4562_v31 = vld [vmem:[%s5431_s2 + $0x94] ss:$12 sps:$4 sm:$0xff]   ;;  %v98_v6 = vsub.s32 2, %v89_v5 }
   0xb   :  { %284 = vmatpush1.bf16.msra.mxu0 %v4072_v9  ;;  %3850 = vmatpush3.bf16.msra.mxu1 %v4071_v8  ;;  %v4102_v32 = vld [vmem:[%s5430_s0 + $0x10] sm:$0xff]   ;;  %v4107_v34 = vld [vmem:[%s5431_s2 + $0x98] ss:$12 sps:$4 sm:$0xff]   ;;  %v4581_v35 = vld [vmem:[%s5431_s2 + $0x7c] ss:$12 sps:$4 sm:$0xff]   ;;  %v90_v8 = vsub.s32 0, %v89_v5 }
   0xc   :  { %285 = vmatprep.subr.bf16.mxu0 %v4073_v10  ;;  %3851 = vmatprep.subr.bf16.mxu1 %v4075_v11  ;;  %v4570_v33 = vld [vmem:[%s5431_s2 + $0x90] ss:$12 sps:$4 sm:$0xff]   ;;  %v4590_v37 = vld [vmem:[%s5431_s2 + $0x78] ss:$12 sps:$4 sm:$0xff]   ;;  %v4116_v40 = vld [vmem:[%s5431_s2 + $0x80] ss:$12 sps:$4 sm:$0xff]  }
   0xd   :  { %v4103_v36 = vld [vmem:[%s5430_s0 + $0x18] sm:$0xff]   ;;  %v4596_v38 = vld [vmem:[%s5431_s2 + $0x64] ss:$12 sps:$4 sm:$0xff]   ;;  %v4610_v41 = vld [vmem:[%s5431_s2 + $0x60] ss:$12 sps:$4 sm:$0xff]   ;;  %v94_v9 = vsub.s32 1, %v89_v5 }
   0xe   :  { %v4111_v39 = vld [vmem:[%s5430_s0 + $0x20] sm:$0xff]   ;;  %v4112_v42 = vld [vmem:[%s5430_s0 + $0x28] sm:$0xff]   ;;  %v4120_v47 = vld [vmem:[%s5430_s0 + $0x30] sm:$0xff]  }
   0xf   :  { %286 = vmatpush1.bf16.msra.mxu0 %v4076_v12  ;;  %3852 = vmatpush3.bf16.msra.mxu1 %v4075_v11  ;;  %v4620_v43 = vld [vmem:[%s5431_s2 + $0x4c] ss:$12 sps:$4 sm:$0xff]   ;;  %v4125_v44 = vld [vmem:[%s5431_s2 + $0x68] ss:$12 sps:$4 sm:$0xff]   ;;  %v4129_v48 = vld [vmem:[%s5431_s2 + $0x50] ss:$12 sps:$4 sm:$0xff]  }
  0x10   :  { %287 = vmatprep.subr.bf16.mxu0 %v4077_v13  ;;  %3853 = vmatprep.subr.bf16.mxu1 %v4079_v14  ;;  %v4628_v45 = vld [vmem:[%s5431_s2 + $0x48] ss:$12 sps:$4 sm:$0xff]   ;;  %v4647_v49 = vld [vmem:[%s5431_s2 + $0x30] ss:$12 sps:$4 sm:$0xff]   ;;  %v4663_v52 = vld [vmem:[%s5431_s2 + $0x18] ss:$12 sps:$4 sm:$0xff]  }
  0x11   :  { %v4633_v46 = vld [vmem:[%s5431_s2 + $0x34] ss:$12 sps:$4 sm:$0xff]   ;;  %v4652_v50 = vld [vmem:[%s5431_s2 + $0x1c] ss:$12 sps:$4 sm:$0xff]   ;;  %v4669_v53 = vld [vmem:[%s5431_s2 + $0x4] ss:$12 sps:$4 sm:$0xff]  }
  0x12   :  { %v4121_v51 = vld [vmem:[%s5430_s0 + $0x38] sm:$0xff]   ;;  %v4680_v55 = vld [vmem:[%s5431_s2] ss:$12 sps:$4 sm:$0xff]   ;;  %v4132_v57 = vld [vmem:[%s5431_s2 + $0x8] ss:$12 sps:$4 sm:$0xff]  }
  0x13   :  { %288 = vmatpush1.bf16.msra.mxu0 %v4080_v15  ;;  %3854 = vmatpush3.bf16.msra.mxu1 %v4079_v14  ;;  %v4130_v54 = vld [vmem:[%s5431_s2 + $0x38] ss:$12 sps:$4 sm:$0xff]   ;;  %v4131_v56 = vld [vmem:[%s5431_s2 + $0x20] ss:$12 sps:$4 sm:$0xff]   ;;  %v4133_v59 = vld [vmem:[%s5431_s2 + $0xb0] ss:$12 sps:$4 sm:$0xff]  }
  0x14   :  { %289 = vmatprep.subr.bf16.mxu0 %v4081_v16  ;;  %3855 = vmatprep.subr.bf16.mxu1 %v4083_v17  ;;  %v4134_v60 = vld [vmem:[%s5431_s2 + $0x98] ss:$12 sps:$4 sm:$0xff]   ;;  %v4135_v61 = vld [vmem:[%s5431_s2 + $0x80] ss:$12 sps:$4 sm:$0xff]   ;;  %v4136_v62 = vld [vmem:[%s5431_s2 + $0x68] ss:$12 sps:$4 sm:$0xff]  }
  0x15   :  { %v4137_v63 = vld [vmem:[%s5431_s2 + $0x50] ss:$12 sps:$4 sm:$0xff]   ;;  %v4138_v0 = vld [vmem:[%s5431_s2 + $0x38] ss:$12 sps:$4 sm:$0xff]   ;;  %v4139_v2 = vld [vmem:[%s5431_s2 + $0x20] ss:$12 sps:$4 sm:$0xff]  }
  0x16   :  { %v4140_v3 = vld [vmem:[%s5431_s2 + $0x8] ss:$12 sps:$4 sm:$0xff]   ;;  %v86_v7 = vld [vmem:[%s5432_s3] sm:$0x7] }
  0x17   :  { %290 = vmatpush1.bf16.msra.mxu0 %v4084_v19  ;;  %3856 = vmatpush3.bf16.msra.mxu1 %v4083_v17  ;;  %v4756_v10 = vrot.slane %v86_v7, %v98_v6  ;;  %v4758_v11 = vrot.slane %v86_v7, %v90_v8  ;;  %v4760_v12 = vrot.slane %v86_v7, %v94_v9 }
  0x18   :  { %291 = vmatprep.subr.bf16.mxu0 %v4085_v20  ;;  %3857 = vmatprep.subr.bf16.mxu1 %v4087_v21 }
  0x1b   :  { %292 = vmatpush1.bf16.msra.mxu0 %v4088_v22  ;;  %3858 = vmatpush3.bf16.msra.mxu1 %v4087_v21 }
  0x1c   :  { %293 = vmatprep.subr.bf16.mxu0 %v4089_v23  ;;  %3859 = vmatprep.subr.bf16.mxu1 %v4091_v24 }
  0x1f   :  { %294 = vmatpush1.bf16.msra.mxu0 %v4092_v25  ;;  %3860 = vmatpush3.bf16.msra.mxu1 %v4091_v24 }
  0x20   :  { %853 = vmatprep.subr.bf16.mxu1 %v4544_v26  ;;  %3877 = vmatprep.subr.bf16.mxu0 %v4412_v30 }
  0x22   :  { %312 = vmatmul.mubr.bf16.vlgmr.msra.gmra.mxu0 %v4093_v18  ;;  %3862 = vmatmul.mubr.bf16.vlgmr.msra.gmra.mxu1 %v4094_v27 }
  0x23   :  { %854 = vmatpush1.bf16.msra.mxu1 %v4552_v28  ;;  %3878 = vmatpush3.bf16.msra.mxu0 %v4098_v29 }
  0x24   :  { %855 = vmatprep.subr.bf16.mxu1 %v4562_v31  ;;  %321 = vmatprep.mubr.bf16.mxu0 %v4411_v1 }
  0x25   :  { %3865 = vmatprep.mubr.bf16.mxu1 %v4102_v32  ;;  %3879 = vmatprep.subr.bf16.mxu0 %v4412_v30 }
  0x27   :  { %856 = vmatpush1.bf16.msra.mxu1 %v4570_v33  ;;  %3880 = vmatpush3.bf16.msra.mxu0 %v4107_v34 }
  0x28   :  { %857 = vmatprep.subr.bf16.mxu1 %v4581_v35  ;;  %3881 = vmatprep.subr.bf16.mxu0 %v4412_v30 }
  0x2a   :  { %322 = vmatmul.mubr.bf16.gmra.mxu0 %v4094_v27  ;;  %3866 = vmatmul.mubr.bf16.gmra.mxu1 %v4103_v36 }
  0x2b   :  { %858 = vmatpush1.bf16.msra.mxu1 %v4590_v37  ;;  %331 = vmatprep.mubr.bf16.mxu0 %v4411_v1 }
  0x2c   :  { %859 = vmatprep.subr.bf16.mxu1 %v4596_v38  ;;  %3869 = vmatprep.mubr.bf16.mxu1 %v4111_v39 }
  0x2d   :  { %3882 = vmatpush3.bf16.msra.mxu0 %v4116_v40 }
  0x2e   :  { %3883 = vmatprep.subr.bf16.mxu0 %v4412_v30 }
  0x2f   :  { %860 = vmatpush1.bf16.msra.mxu1 %v4610_v41 }
  0x30   :  { %861 = vmatprep.subr.bf16.mxu1 %v4620_v43 }
  0x31   :  { %3884 = vmatpush3.bf16.msra.mxu0 %v4125_v44 }
  0x32   :  { %332 = vmatmul.mubr.bf16.gmra.mxu0 %v4102_v32  ;;  %3870 = vmatmul.mubr.bf16.gmra.mxu1 %v4112_v42 }
  0x33   :  { %862 = vmatpush1.bf16.msra.mxu1 %v4628_v45  ;;  %341 = vmatprep.mubr.bf16.mxu0 %v4411_v1 }
  0x34   :  { %863 = vmatprep.subr.bf16.mxu1 %v4633_v46  ;;  %3873 = vmatprep.mubr.bf16.mxu1 %v4120_v47 }
  0x35   :  { %3885 = vmatprep.subr.bf16.mxu0 %v4412_v30 }
  0x36   :  { %3886 = vmatpush3.bf16.msra.mxu0 %v4129_v48 }
  0x37   :  { %864 = vmatpush1.bf16.msra.mxu1 %v4647_v49  ;;  %3887 = vmatprep.subr.bf16.mxu0 %v4412_v30 }
  0x38   :  { %865 = vmatprep.subr.bf16.mxu1 %v4652_v50 }
  0x3a   :  { %342 = vmatmul.mubr.bf16.gmra.mxu0 %v4103_v36  ;;  %3874 = vmatmul.mubr.bf16.gmra.mxu1 %v4121_v51 }
  0x3b   :  { %866 = vmatpush1.bf16.msra.mxu1 %v4663_v52  ;;  %351 = vmatprep.mubr.bf16.mxu0 %v4411_v1 }
  0x3c   :  { %867 = vmatprep.subr.bf16.mxu1 %v4669_v53  ;;  %885 = vmatprep.mubr.bf16.mxu1 %v4411_v1 }
  0x3d   :  { %3888 = vmatpush3.bf16.msra.mxu0 %v4130_v54 }
  0x3e   :  { %3889 = vmatprep.subr.bf16.mxu0 %v4412_v30 }
  0x3f   :  { %868 = vmatpush1.bf16.msra.mxu1 %v4680_v55 }
  0x40   :  { %1163 = vmatprep.subr.bf16.mxu1 %v4544_v26 }
  0x41   :  { %3890 = vmatpush3.bf16.msra.mxu0 %v4131_v56 }
  0x42   :  { %352 = vmatmul.mubr.bf16.gmra.mxu0 %v4111_v39  ;;  %886 = vmatmul.mubr.bf16.vlgmr.msra.gmra.mxu1 %v4413_v58 }
  0x43   :  { %361 = vmatprep.mubr.bf16.mxu0 %v4411_v1  ;;  %3891 = vmatprep.subr.bf16.mxu0 %v4412_v30 }
  0x44   :  { %1164 = vmatpush1.bf16.msra.mxu1 %v4552_v28  ;;  %1195 = vmatprep.mubr.bf16.mxu1 %v4411_v1 }
  0x45   :  { %3892 = vmatpush3.bf16.msra.mxu0 %v4132_v57  ;;  %1165 = vmatprep.subr.bf16.mxu1 %v4562_v31 }
  0x46   :  { %3897 = vmatprep.subr.bf16.mxu0 %v4412_v30 }
  0x48   :  { %1166 = vmatpush1.bf16.msra.mxu1 %v4570_v33 }
  0x49   :  { %1167 = vmatprep.subr.bf16.mxu1 %v4581_v35 }
  0x4a   :  { %362 = vmatmul.mubr.bf16.gmra.mxu0 %v4112_v42 }
  0x4b   :  { %371 = vmatprep.mubr.bf16.mxu0 %v4411_v1 }
  0x4c   :  { %1168 = vmatpush1.bf16.msra.mxu1 %v4590_v37 }
  0x4d   :  { %1169 = vmatprep.subr.bf16.mxu1 %v4596_v38 }
  0x50   :  { %1170 = vmatpush1.bf16.msra.mxu1 %v4610_v41 }
  0x51   :  { %1171 = vmatprep.subr.bf16.mxu1 %v4620_v43 }
  0x52   :  { %372 = vmatmul.mubr.bf16.gmra.mxu0 %v4120_v47 }
  0x53   :  { %381 = vmatprep.mubr.bf16.mxu0 %v4411_v1 }
  0x54   :  { %1172 = vmatpush1.bf16.msra.mxu1 %v4628_v45 }
  0x55   :  { %1173 = vmatprep.subr.bf16.mxu1 %v4633_v46 }
  0x58   :  { %1174 = vmatpush1.bf16.msra.mxu1 %v4647_v49 }
  0x59   :  { %1175 = vmatprep.subr.bf16.mxu1 %v4652_v50 }
  0x5a   :  { %382 = vmatmul.mubr.bf16.gmra.mxu0 %v4121_v51 }
  0x5b   :  { %3893 = vmatprep.mubr.msk.bf16.mxu0 %vm4414_vm0, %v4412_v30 }
  0x5c   :  { %1176 = vmatpush1.bf16.msra.mxu1 %v4663_v52 }
  0x5d   :  { %1177 = vmatprep.subr.bf16.mxu1 %v4669_v53 }
  0x60   :  { %1178 = vmatpush1.bf16.msra.mxu1 %v4680_v55 }
  0x61   :  { %1475 = vmatprep.subr.bf16.mxu1 %v4544_v26 }
  0x62   :  { %3894 = vmatmul.mubr.bf16.vlgmr.msra.gmra.mxu0 %v4413_v58 }
  0x63   :  { %3913 = vmatprep.mubr.msk.bf16.mxu0 %vm4414_vm0, %v4412_v30  ;;  %3898 = vmatpush3.bf16.msra.mxu0 %v4133_v59 }
  0x64   :  { %3899 = vmatprep.subr.bf16.mxu0 %v4412_v30 }
  0x67   :  { %3900 = vmatpush3.bf16.msra.mxu0 %v4134_v60 }
  0x68   :  { %3901 = vmatprep.subr.bf16.mxu0 %v4412_v30 }
  0x6b   :  { %3902 = vmatpush3.bf16.msra.mxu0 %v4135_v61 }
  0x6c   :  { %3903 = vmatprep.subr.bf16.mxu0 %v4412_v30 }
  0x6f   :  { %3904 = vmatpush3.bf16.msra.mxu0 %v4136_v62 }
  0x70   :  { %3905 = vmatprep.subr.bf16.mxu0 %v4412_v30 }
  0x73   :  { %3906 = vmatpush3.bf16.msra.mxu0 %v4137_v63 }
  0x74   :  { %3907 = vmatprep.subr.bf16.mxu0 %v4412_v30 }
  0x77   :  { %3908 = vmatpush3.bf16.msra.mxu0 %v4138_v0 }
  0x78   :  { %3909 = vmatprep.subr.bf16.mxu0 %v4412_v30 }
  0x7b   :  { %3910 = vmatpush3.bf16.msra.mxu0 %v4139_v2 }
  0x7c   :  { %3911 = vmatprep.subr.bf16.mxu0 %v4412_v30 }
  0x7f   :  { %3912 = vmatpush3.bf16.msra.mxu0 %v4140_v3 }
  0x80   :  { %3917 = vmatprep.subr.bf16.mxu0 %v4412_v30 }
  0xe2   :  { %v313_v13 = vpop.f32.mrf.mxu0  ;;  %v3863_v14 = vpop.f32.mrf.mxu1 }
  0xe3   :  { %v435_v15 = vadd.f32 %v3863_v14, %v4756_v10  ;;  %v314_v18 = vadd.f32 %v313_v13, %v4758_v11 }
  0xe4   :  { %v315_v16 = vpop.f32.mrf.mxu0  ;;  %v426_v17 = vpop.f32.mrf.mxu1 }
  0xe5   :  { %v3658_v19 = vpack.c.bf16 %v435_v15, %v435_v15  ;;  %v316_v20 = vadd.f32 %v315_v16, %v4760_v12  ;;  %v427_v21 = vadd.f32 %v426_v17, %v4756_v10 }
  0xe6   :  { %v317_v22 = vpop.f32.mrf.mxu0  ;;  %v3864_v23 = vpop.f32.mrf.mxu1 }
  0xe7   :  { %654 = vst [vmem:[#allocation4 + $0x20] sm:$0xf] %v3658_v19  ;;  %v4766_v24 = vpack.c.bf16 %v316_v20, %v314_v18  ;;  %v3654_v25 = vpack.c.bf16 %v427_v21, %v427_v21  ;;  %v438_v26 = vadd.f32 %v3864_v23, %v4756_v10  ;;  %v318_v29 = vadd.f32 %v317_v22, %v4758_v11 }
  0xe8   :  { %v319_v27 = vpop.f32.mrf.mxu0  ;;  %v429_v28 = vpop.f32.mrf.mxu1 }
  0xe9   :  { %650 = vst [vmem:[#allocation4 + $0x8] sm:$0xf] %v3654_v25  ;;  %v3660_v31 = vpack.c.bf16 %v438_v26, %v438_v26  ;;  %v320_v32 = vadd.f32 %v319_v27, %v4760_v12  ;;  %v430_v33 = vadd.f32 %v429_v28, %v4756_v10 }
  0xea   :  { %v323_v34 = vpop.f32.mrf.mxu0  ;;  %v3867_v35 = vpop.f32.mrf.mxu1 }
  0xeb   :  { %656 = vst [vmem:[#allocation4 + $0x2c] sm:$0xf] %v3660_v31  ;;  %v4772_v36 = vpack.c.bf16 %v320_v32, %v318_v29  ;;  %v3656_v37 = vpack.c.bf16 %v430_v33, %v430_v33  ;;  %v451_v39 = vadd.f32 %v3867_v35, %v4756_v10  ;;  %v324_v44 = vadd.f32 %v323_v34, %v4758_v11 }
  0xec   :  { %v325_v40 = vpop.f32.mrf.mxu0  ;;  %v442_v42 = vpop.f32.mrf.mxu1 }
  0xed   :  { %652 = vst [vmem:[#allocation4 + $0x14] sm:$0xf] %v3656_v37  ;;  %v3666_v47 = vpack.c.bf16 %v451_v39, %v451_v39  ;;  %v326_v48 = vadd.f32 %v325_v40, %v4760_v12  ;;  %v443_v51 = vadd.f32 %v442_v42, %v4756_v10 }
  0xee   :  { %v327_v54 = vpop.f32.mrf.mxu0  ;;  %v3868_v56 = vpop.f32.mrf.mxu1 }
  0xef   :  { %662 = vst [vmem:[#allocation4 + $0x50] sm:$0xf] %v3666_v47  ;;  %v4778_v57 = vpack.c.bf16 %v326_v48, %v324_v44  ;;  %v3662_v58 = vpack.c.bf16 %v443_v51, %v443_v51  ;;  %v454_v59 = vadd.f32 %v3868_v56, %v4756_v10  ;;  %v328_v62 = vadd.f32 %v327_v54, %v4758_v11 }
  0xf0   :  { %v329_v60 = vpop.f32.mrf.mxu0  ;;  %v445_v61 = vpop.f32.mrf.mxu1 }
  0xf1   :  { %658 = vst [vmem:[#allocation4 + $0x38] sm:$0xf] %v3662_v58  ;;  %v3668_v63 = vpack.c.bf16 %v454_v59, %v454_v59  ;;  %v330_v0 = vadd.f32 %v329_v60, %v4760_v12  ;;  %v446_v2 = vadd.f32 %v445_v61, %v4756_v10  ;;  %v941_v60 = vunpack.c.l.bf16 %v4766_v24 }
  0xf2   :  { %v333_v3 = vpop.f32.mrf.mxu0  ;;  %v3871_v4 = vpop.f32.mrf.mxu1 }
  0xf3   :  { %664 = vst [vmem:[#allocation4 + $0x5c] sm:$0xf] %v3668_v63  ;;  %v4784_v5 = vpack.c.bf16 %v330_v0, %v328_v62  ;;  %v3664_v6 = vpack.c.bf16 %v446_v2, %v446_v2  ;;  %v467_v7 = vadd.f32 %v3871_v4, %v4756_v10  ;;  %v334_v13 = vadd.f32 %v333_v3, %v4758_v11 }
  0xf4   :  { %v335_v8 = vpop.f32.mrf.mxu0  ;;  %v458_v9 = vpop.f32.mrf.mxu1 }
  0xf5   :  { %660 = vst [vmem:[#allocation4 + $0x44] sm:$0xf] %v3664_v6  ;;  %v3674_v14 = vpack.c.bf16 %v467_v7, %v467_v7  ;;  %v336_v15 = vadd.f32 %v335_v8, %v4760_v12  ;;  %v459_v16 = vadd.f32 %v458_v9, %v4756_v10 }
  0xf6   :  { %v337_v17 = vpop.f32.mrf.mxu0  ;;  %v3872_v18 = vpop.f32.mrf.mxu1 }
  0xf7   :  { %670 = vst [vmem:[#allocation4 + $0x80] sm:$0xf] %v3674_v14  ;;  %v4790_v19 = vpack.c.bf16 %v336_v15, %v334_v13  ;;  %v3670_v20 = vpack.c.bf16 %v459_v16, %v459_v16  ;;  %v470_v21 = vadd.f32 %v3872_v18, %v4756_v10  ;;  %v338_v25 = vadd.f32 %v337_v17, %v4758_v11 }
  0xf8   :  { %v339_v22 = vpop.f32.mrf.mxu0  ;;  %v461_v23 = vpop.f32.mrf.mxu1  ;;  %v944_v18 = vunpack.c.l.bf16 %v4772_v36 }
  0xf9   :  { %666 = vst [vmem:[#allocation4 + $0x68] sm:$0xf] %v3670_v20  ;;  %v3676_v26 = vpack.c.bf16 %v470_v21, %v470_v21  ;;  %v340_v27 = vadd.f32 %v339_v22, %v4760_v12  ;;  %v462_v28 = vadd.f32 %v461_v23, %v4756_v10 }
  0xfa   :  { %v343_v29 = vpop.f32.mrf.mxu0  ;;  %v3875_v31 = vpop.f32.mrf.mxu1 }
  0xfb   :  { %672 = vst [vmem:[#allocation4 + $0x8c] sm:$0xf] %v3676_v26  ;;  %v4796_v32 = vpack.c.bf16 %v340_v27, %v338_v25  ;;  %v3672_v33 = vpack.c.bf16 %v462_v28, %v462_v28  ;;  %v483_v34 = vadd.f32 %v3875_v31, %v4756_v10  ;;  %v344_v39 = vadd.f32 %v343_v29, %v4758_v11 }
  0xfc   :  { %v345_v35 = vpop.f32.mrf.mxu0  ;;  %v474_v37 = vpop.f32.mrf.mxu1  ;;  %v942_v25 = vunpack.c.h.bf16 %v4766_v24  ;;  %v945_v31 = vunpack.c.h.bf16 %v4772_v36 }
  0xfd   :  { %668 = vst [vmem:[#allocation4 + $0x74] sm:$0xf] %v3672_v33  ;;  %v3682_v40 = vpack.c.bf16 %v483_v34, %v483_v34  ;;  %v346_v42 = vadd.f32 %v345_v35, %v4760_v12  ;;  %v475_v44 = vadd.f32 %v474_v37, %v4756_v10 }
  0xfe   :  { %v347_v47 = vpop.f32.mrf.mxu0  ;;  %v3876_v48 = vpop.f32.mrf.mxu1 }
  0xff   :  { %678 = vst [vmem:[#allocation4 + $0xb0] sm:$0xf] %v3682_v40  ;;  %v3665_v51 = vpack.c.bf16 %v346_v42, %v344_v39  ;;  %v3678_v54 = vpack.c.bf16 %v475_v44, %v475_v44  ;;  %v486_v56 = vadd.f32 %v3876_v48, %v4756_v10  ;;  %v348_v61 = vadd.f32 %v347_v47, %v4758_v11 }
 0x100   :  { %v349_v58 = vpop.f32.mrf.mxu0  ;;  %v477_v59 = vpop.f32.mrf.mxu1 }
 0x101   :  { %661 = vst [vmem:[#allocation4 + $0x48] sm:$0xff] %v3665_v51  ;;  %674 = vst [vmem:[#allocation4 + $0x98] sm:$0xf] %v3678_v54  ;;  %v3684_v62 = vpack.c.bf16 %v486_v56, %v486_v56  ;;  %v350_v63 = vadd.f32 %v349_v58, %v4760_v12  ;;  %v478_v0 = vadd.f32 %v477_v59, %v4756_v10 }
 0x102   :  { %v353_v2 = vpop.f32.mrf.mxu0  ;;  %v887_v3 = vpop.f32.mrf.mxu1 }
 0x103   :  { %680 = vst [vmem:[#allocation4 + $0xbc] sm:$0xf] %v3684_v62  ;;  %v3667_v4 = vpack.c.bf16 %v350_v63, %v348_v61  ;;  %v3680_v6 = vpack.c.bf16 %v478_v0, %v478_v0  ;;  %v947_v7 = vadd.f32 %v941_v60, %v887_v3  ;;  %v354_v13 = vadd.f32 %v353_v2, %v4758_v11 }
 0x104   :  { %v355_v8 = vpop.f32.mrf.mxu0  ;;  %v889_v9 = vpop.f32.mrf.mxu1 }
 0x105   :  { %663 = vst [vmem:[#allocation4 + $0x54] sm:$0xff] %v3667_v4  ;;  %676 = vst [vmem:[#allocation4 + $0xa4] sm:$0xf] %v3680_v6  ;;  %v3414_v14 = vmul.f32 -1.442695, %v947_v7  ;;  %v356_v15 = vadd.f32 %v355_v8, %v4760_v12  ;;  %v961_v33 = vadd.f32 %v942_v25, %v889_v9 }
 0x106   :  { %v357_v16 = vpop.f32.mrf.mxu0  ;;  %v891_v17 = vpop.f32.mrf.mxu1  ;;  %v938_v25 = vld [vmem:[#allocation4 + $0x8] ss:$12 sps:$4 sm:$0xff]  }
 0x107   :  { %4245 = vpow2.f32 %v3414_v14  ;;  %v3669_v10 = vpack.c.bf16 %v356_v15, %v354_v13  ;;  %v948_v20 = vadd.f32 %v944_v18, %v891_v17  ;;  %v358_v22 = vadd.f32 %v357_v16, %v4758_v11  ;;  %v4827_v18 = vld [vmem:[%s5433_s4] ss:$0 sm:$0xff] }
 0x108   :  { %v359_v21 = vpop.f32.mrf.mxu0  ;;  %v893_v27 = vpop.f32.mrf.mxu1  ;;  %v3416_v44 = vmul.f32 -1.442695, %v961_v33 }
 0x109   :  { %665 = vst [vmem:[#allocation4 + $0x60] sm:$0xff] %v3669_v10  ;;  %v360_v23 = vadd.f32 %v359_v21, %v4760_v12  ;;  %v3415_v26 = vmul.f32 -1.442695, %v948_v20  ;;  %v962_v35 = vadd.f32 %v945_v31, %v893_v27 }
 0x10a   :  { %v363_v28 = vpop.f32.mrf.mxu0 }
 0x10b   :  { %v3671_v29 = vpack.c.bf16 %v360_v23, %v358_v22  ;;  %4247 = vpow2.f32 %v3415_v26  ;;  %v364_v37 = vadd.f32 %v363_v28, %v4758_v11  ;;  %v3417_v24 = vmul.f32 -1.442695, %v962_v35 }
 0x10c   :  { %v365_v34 = vpop.f32.mrf.mxu0  ;;  %4249 = vpow2.f32 %v3416_v44 }
 0x10d   :  { %667 = vst [vmem:[#allocation4 + $0x6c] sm:$0xff] %v3671_v29  ;;  %v366_v39 = vadd.f32 %v365_v34, %v4760_v12  ;;  %4251 = vpow2.f32 %v3417_v24  ;;  %v943_v34 = vunpack.c.l.bf16 %v938_v25 }
 0x10e   :  { %v367_v40 = vpop.f32.mrf.mxu0 }
 0x10f   :  { %v3673_v42 = vpack.c.bf16 %v366_v39, %v364_v37  ;;  %v368_v48 = vadd.f32 %v367_v40, %v4758_v11 }
 0x110   :  { %v369_v47 = vpop.f32.mrf.mxu0 }
 0x111   :  { %669 = vst [vmem:[#allocation4 + $0x78] sm:$0xff] %v3673_v42  ;;  %v370_v51 = vadd.f32 %v369_v47, %v4760_v12  ;;  %v946_v42 = vunpack.c.h.bf16 %v938_v25 }
 0x112   :  { %v373_v36 = vpop.f32.mrf.mxu0 }
 0x113   :  { %v3675_v54 = vpack.c.bf16 %v370_v51, %v368_v48  ;;  %v374_v60 = vadd.f32 %v373_v36, %v4758_v11 }
 0x114   :  { %v4246_v56 = vpop.eup %4245  ;;  %v375_v58 = vpop.f32.mrf.mxu0 }
 0x115   :  { %v955_v59 = vadd.f32 1.0, %v4246_v56  ;;  %671 = vst [vmem:[#allocation4 + $0x84] sm:$0xff] %v3675_v54  ;;  %v376_v61 = vadd.f32 %v375_v58, %v4760_v12 }
 0x116   :  { %v377_v62 = vpop.f32.mrf.mxu0 }
 0x117   :  { %4253 = vrcp.f32 %v955_v59  ;;  %v3677_v63 = vpack.c.bf16 %v376_v61, %v374_v60  ;;  %v378_v3 = vadd.f32 %v377_v62, %v4758_v11 }
 0x118   :  { %v379_v0 = vpop.f32.mrf.mxu0  ;;  %v4248_v2 = vpop.eup %4247 }
 0x119   :  { %673 = vst [vmem:[#allocation4 + $0x90] sm:$0xff] %v3677_v63  ;;  %v380_v4 = vadd.f32 %v379_v0, %v4760_v12  ;;  %v956_v6 = vadd.f32 1.0, %v4248_v2  ;;  %v4250_v10 = vpop.eup %4249  ;;  %v4405_v2 = vld [vmem:[%s5431_s2 + $0xa8] ss:$12 sps:$4 sm:$0xff]  }
 0x11a   :  { %v383_v7 = vpop.f32.mrf.mxu0  ;;  %v4252_v22 = vpop.eup %4251  ;;  %v969_v29 = vadd.f32 1.0, %v4250_v10 }
 0x11b   :  { %v3679_v8 = vpack.c.bf16 %v380_v4, %v378_v3  ;;  %4255 = vrcp.f32 %v956_v6  ;;  %v384_v13 = vadd.f32 %v383_v7, %v4758_v11  ;;  %v970_v33 = vadd.f32 1.0, %v4252_v22  ;;  %v4406_v3 = vld [vmem:[%s5431_s2 + $0x94] ss:$12 sps:$4 sm:$0xff]   ;;  %v4407_v4 = vld [vmem:[%s5431_s2 + $0x90] ss:$12 sps:$4 sm:$0xff]  }
 0x11c   :  { %v385_v9 = vpop.f32.mrf.mxu0  ;;  %4257 = vrcp.f32 %v969_v29  ;;  %v4408_v6 = vld [vmem:[%s5431_s2 + $0x7c] ss:$12 sps:$4 sm:$0xff]   ;;  %v4409_v7 = vld [vmem:[%s5431_s2 + $0x78] ss:$12 sps:$4 sm:$0xff]   ;;  %v1253_v22 = vunpack.c.h.bf16 %v4778_v57 }
 0x11d   :  { %675 = vst [vmem:[#allocation4 + $0x9c] sm:$0xff] %v3679_v8  ;;  %v386_v14 = vadd.f32 %v385_v9, %v4760_v12  ;;  %4259 = vrcp.f32 %v970_v33 }
 0x11e   :  { %v387_v15 = vpop.f32.mrf.mxu0 }
 0x11f   :  { %v3681_v16 = vpack.c.bf16 %v386_v14, %v384_v13  ;;  %v388_v20 = vadd.f32 %v387_v15, %v4758_v11 }
 0x120   :  { %v389_v17 = vpop.f32.mrf.mxu0 }
 0x121   :  { %677 = vst [vmem:[#allocation4 + $0xa8] sm:$0xff] %v3681_v16  ;;  %v390_v21 = vadd.f32 %v389_v17, %v4760_v12  ;;  %v1255_v16 = vunpack.c.l.bf16 %v4784_v5 }
 0x122   :  { %v930_v23 = vpop.f32.mrf.mxu0 }
 0x123   :  { %v3683_v26 = vpack.c.bf16 %v390_v21, %v388_v20  ;;  %v975_v27 = vadd.f32 %v4827_v18, %v930_v23 }
 0x124   :  { %v4254_v28 = vpop.eup %4253  ;;  %v3895_v31 = vpop.f32.mrf.mxu0 }
 0x125   :  { %679 = vst [vmem:[#allocation4 + $0xb4] sm:$0xff] %v3683_v26  ;;  %v977_v35 = vmul.f32 %v4254_v28, %v975_v27  ;;  %v1256_v26 = vunpack.c.h.bf16 %v4784_v5 }
 0x126   :  { %v933_v37 = vpop.f32.mrf.mxu0 }
 0x127   :  { %v979_v39 = vadd.f32 %v977_v35, %v943_v34  ;;  %v976_v40 = vadd.f32 %v4827_v18, %v933_v37 }
 0x128   :  { %v3896_v11 = vpop.f32.mrf.mxu0  ;;  %v4256_v12 = vpop.eup %4255 }
 0x129   :  { %4261 = vtanh.f32 %v979_v39  ;;  %v978_v44 = vmul.f32 %v4256_v12, %v976_v40  ;;  %v4258_v24 = vpop.eup %4257 }
 0x12a   :  { %v4260_v48 = vpop.eup %4259  ;;  %v983_v36 = vsub.f32 1.0, %v4258_v24  ;;  %v987_v60 = vmul.f32 0.0, %v4258_v24 }
 0x12b   :  { %v980_v47 = vadd.f32 %v978_v44, %v946_v42  ;;  %v984_v54 = vsub.f32 1.0, %v4260_v48  ;;  %v988_v61 = vmul.f32 0.0, %v4260_v48 }
 0x12d   :  { %4263 = vtanh.f32 %v980_v47 }
 0x136   :  { %v4262_v51 = vpop.eup %4261 }
 0x137   :  { %v985_v56 = vmul.f32 %v4262_v51, %v983_v36 }
 0x139   :  { %v4833_v62 = vadd.f32 %v987_v60, %v985_v56 }
 0x13a   :  { %v4264_v58 = vpop.eup %4263 }
 0x13b   :  { %v986_v59 = vmul.f32 %v4264_v58, %v984_v54 }
 0x13d   :  { %v4835_v63 = vadd.f32 %v988_v61, %v986_v59 }
 0x13f   :  { %v991_v0 = vpack.c.bf16 %v4835_v63, %v4833_v62 }
 0x141   :  { %3705 = vst [vmem:[%s5434_s7] sm:$0xff] %v991_v0   ;;  %1196 = vmatmul.mubr.bf16.vlgmr.msra.gmra.mxu1 %v991_v0  ;;  %3914 = vmatmul.mubr.bf16.vlgmr.msra.gmra.mxu0 %v991_v0 }
 0x142   :  { %1476 = vmatpush1.bf16.msra.mxu1 %v4405_v2  ;;  %1507 = vmatprep.mubr.bf16.mxu1 %v4411_v1 }
 0x143   :  { %1477 = vmatprep.subr.bf16.mxu1 %v4406_v3  ;;  %3933 = vmatprep.mubr.msk.bf16.mxu0 %vm4414_vm0, %v4412_v30 }
 0x146   :  { %1478 = vmatpush1.bf16.msra.mxu1 %v4407_v4 }
 0x147   :  { %1479 = vmatprep.subr.bf16.mxu1 %v4408_v6 }
 0x14a   :  { %1480 = vmatpush1.bf16.msra.mxu1 %v4409_v7 }
 0x14b   :  { %1481 = vmatprep.subr.bf16.mxu1 %v4596_v38  ;;  %v4141_v38 = vld [vmem:[%s5431_s2 + $0xb0] ss:$12 sps:$4 sm:$0xff]  }
 0x14c   :  { %3918 = vmatpush3.bf16.msra.mxu0 %v4141_v38 }
 0x14d   :  { %3919 = vmatprep.subr.bf16.mxu0 %v4412_v30 }
 0x14e   :  { %1482 = vmatpush1.bf16.msra.mxu1 %v4610_v41  ;;  %v4142_v41 = vld [vmem:[%s5431_s2 + $0x98] ss:$12 sps:$4 sm:$0xff]  }
 0x14f   :  { %1483 = vmatprep.subr.bf16.mxu1 %v4620_v43  ;;  %v4143_v43 = vld [vmem:[%s5431_s2 + $0x80] ss:$12 sps:$4 sm:$0xff]  }
 0x150   :  { %3920 = vmatpush3.bf16.msra.mxu0 %v4142_v41 }
 0x151   :  { %3921 = vmatprep.subr.bf16.mxu0 %v4412_v30 }
 0x152   :  { %1484 = vmatpush1.bf16.msra.mxu1 %v4628_v45  ;;  %v4144_v45 = vld [vmem:[%s5431_s2 + $0x68] ss:$12 sps:$4 sm:$0xff]  }
 0x153   :  { %1485 = vmatprep.subr.bf16.mxu1 %v4633_v46  ;;  %v4145_v46 = vld [vmem:[%s5431_s2 + $0x50] ss:$12 sps:$4 sm:$0xff]  }
 0x154   :  { %3922 = vmatpush3.bf16.msra.mxu0 %v4143_v43 }
 0x155   :  { %3923 = vmatprep.subr.bf16.mxu0 %v4412_v30 }
 0x156   :  { %1486 = vmatpush1.bf16.msra.mxu1 %v4647_v49  ;;  %v4146_v49 = vld [vmem:[%s5431_s2 + $0x38] ss:$12 sps:$4 sm:$0xff]  }
 0x157   :  { %1487 = vmatprep.subr.bf16.mxu1 %v4652_v50  ;;  %v4147_v50 = vld [vmem:[%s5431_s2 + $0x20] ss:$12 sps:$4 sm:$0xff]  }
 0x158   :  { %3924 = vmatpush3.bf16.msra.mxu0 %v4144_v45  ;;  %v4925_v45 = vld [vmem:[%s5431_s2 + $0xac] ss:$12 sps:$4 sm:$0xff]  }
 0x159   :  { %3925 = vmatprep.subr.bf16.mxu0 %v4412_v30 }
 0x15a   :  { %1488 = vmatpush1.bf16.msra.mxu1 %v4663_v52  ;;  %v4148_v52 = vld [vmem:[%s5431_s2 + $0x8] ss:$12 sps:$4 sm:$0xff]  }
 0x15b   :  { %1489 = vmatprep.subr.bf16.mxu1 %v4669_v53  ;;  %v1252_v53 = vunpack.c.l.bf16 %v4778_v57  ;;  %v1249_v57 = vld [vmem:[#allocation4 + $0x20] ss:$12 sps:$4 sm:$0xff]  }
 0x15c   :  { %3926 = vmatpush3.bf16.msra.mxu0 %v4145_v46  ;;  %v1254_v44 = vunpack.c.l.bf16 %v1249_v57  ;;  %v1257_v36 = vunpack.c.h.bf16 %v1249_v57  ;;  %v4930_v46 = vld [vmem:[%s5431_s2 + $0xa8] ss:$12 sps:$4 sm:$0xff]   ;;  %v1567_v57 = vunpack.c.l.bf16 %v4796_v32 }
 0x15d   :  { %3927 = vmatprep.subr.bf16.mxu0 %v4412_v30 }
 0x15e   :  { %1490 = vmatpush1.bf16.msra.mxu1 %v4680_v55 }
 0x15f   :  { %1787 = vmatprep.subr.bf16.mxu1 %v4925_v45 }
 0x160   :  { %3928 = vmatpush3.bf16.msra.mxu0 %v4146_v49  ;;  %v4152_v49 = vld [vmem:[%s5431_s2 + $0xb0] ss:$12 sps:$4 sm:$0xff]  }
 0x161   :  { %3929 = vmatprep.subr.bf16.mxu0 %v4412_v30 }
 0x164   :  { %3930 = vmatpush3.bf16.msra.mxu0 %v4147_v50  ;;  %v4940_v50 = vld [vmem:[%s5431_s2 + $0x94] ss:$12 sps:$4 sm:$0xff]  }
 0x165   :  { %3931 = vmatprep.subr.bf16.mxu0 %v4412_v30 }
 0x168   :  { %3932 = vmatpush3.bf16.msra.mxu0 %v4148_v52  ;;  %v4946_v52 = vld [vmem:[%s5431_s2 + $0x90] ss:$12 sps:$4 sm:$0xff]  }
 0x169   :  { %3937 = vmatprep.subr.bf16.mxu0 %v4412_v30 }
 0x201   :  { %v1197_v55 = vpop.f32.mrf.mxu1  ;;  %v1240_v8 = vpop.f32.mrf.mxu0 }
 0x202   :  { %v1258_v9 = vadd.f32 %v1252_v53, %v1197_v55  ;;  %v1286_v11 = vadd.f32 %v4827_v18, %v1240_v8  ;;  %v4156_v53 = vld [vmem:[%s5431_s2 + $0x98] ss:$12 sps:$4 sm:$0xff]   ;;  %v4956_v55 = vld [vmem:[%s5431_s2 + $0x7c] ss:$12 sps:$4 sm:$0xff]  }
 0x203   :  { %v1199_v13 = vpop.f32.mrf.mxu1  ;;  %v3915_v14 = vpop.f32.mrf.mxu0  ;;  %v4962_v8 = vld [vmem:[%s5431_s2 + $0x78] ss:$12 sps:$4 sm:$0xff]  }
 0x204   :  { %v3444_v15 = vmul.f32 -1.442695, %v1258_v9  ;;  %v1272_v27 = vadd.f32 %v1253_v22, %v1199_v13  ;;  %v4160_v9 = vld [vmem:[%s5431_s2 + $0x80] ss:$12 sps:$4 sm:$0xff]   ;;  %v4972_v13 = vld [vmem:[%s5431_s2 + $0x64] ss:$12 sps:$4 sm:$0xff]  }
 0x205   :  { %v1201_v17 = vpop.f32.mrf.mxu1  ;;  %v1243_v10 = vpop.f32.mrf.mxu0  ;;  %v4978_v14 = vld [vmem:[%s5431_s2 + $0x60] ss:$12 sps:$4 sm:$0xff]   ;;  %v4172_v22 = vld [vmem:[%s5431_s2 + $0x38] ss:$12 sps:$4 sm:$0xff]  }
 0x206   :  { %4265 = vpow2.f32 %v3444_v15  ;;  %v1259_v20 = vadd.f32 %v1255_v16, %v1201_v17  ;;  %v3446_v29 = vmul.f32 -1.442695, %v1272_v27  ;;  %v1287_v48 = vadd.f32 %v4827_v18, %v1243_v10  ;;  %v4164_v15 = vld [vmem:[%s5431_s2 + $0x68] ss:$12 sps:$4 sm:$0xff]   ;;  %v4987_v16 = vld [vmem:[%s5431_s2 + $0x4c] ss:$12 sps:$4 sm:$0xff]  }
 0x207   :  { %v3916_v21 = vpop.f32.mrf.mxu0  ;;  %v1203_v25 = vpop.f32.mrf.mxu1  ;;  %v4993_v17 = vld [vmem:[%s5431_s2 + $0x48] ss:$12 sps:$4 sm:$0xff]   ;;  %v4168_v10 = vld [vmem:[%s5431_s2 + $0x50] ss:$12 sps:$4 sm:$0xff]  }
 0x208   :  { %v3445_v23 = vmul.f32 -1.442695, %v1259_v20  ;;  %v1273_v28 = vadd.f32 %v1256_v26, %v1203_v25  ;;  %v5003_v20 = vld [vmem:[%s5431_s2 + $0x34] ss:$12 sps:$4 sm:$0xff]   ;;  %v5009_v21 = vld [vmem:[%s5431_s2 + $0x30] ss:$12 sps:$4 sm:$0xff]  }
 0x209   :  { %v5025_v25 = vld [vmem:[%s5431_s2 + $0x18] ss:$12 sps:$4 sm:$0xff]   ;;  %v4176_v26 = vld [vmem:[%s5431_s2 + $0x20] ss:$12 sps:$4 sm:$0xff]  }
 0x20a   :  { %4267 = vpow2.f32 %v3445_v23  ;;  %v3447_v31 = vmul.f32 -1.442695, %v1273_v28  ;;  %v5019_v23 = vld [vmem:[%s5431_s2 + $0x1c] ss:$12 sps:$4 sm:$0xff]   ;;  %v5035_v27 = vld [vmem:[%s5431_s2 + $0x4] ss:$12 sps:$4 sm:$0xff]  }
 0x20b   :  { %4269 = vpow2.f32 %v3446_v29  ;;  %v5041_v28 = vld [vmem:[%s5431_s2] ss:$12 sps:$4 sm:$0xff]   ;;  %v4180_v29 = vld [vmem:[%s5431_s2 + $0x8] ss:$12 sps:$4 sm:$0xff]  }
 0x20c   :  { %4271 = vpow2.f32 %v3447_v31  ;;  %v1564_v31 = vunpack.c.l.bf16 %v4790_v19 }
 0x213   :  { %v4266_v33 = vpop.eup %4265 }
 0x214   :  { %v1266_v34 = vadd.f32 1.0, %v4266_v33 }
 0x216   :  { %4273 = vrcp.f32 %v1266_v34 }
 0x217   :  { %v4268_v35 = vpop.eup %4267 }
 0x218   :  { %v1267_v37 = vadd.f32 1.0, %v4268_v35  ;;  %v4270_v39 = vpop.eup %4269 }
 0x219   :  { %v4272_v40 = vpop.eup %4271  ;;  %v1280_v12 = vadd.f32 1.0, %v4270_v39 }
 0x21a   :  { %4275 = vrcp.f32 %v1267_v37  ;;  %v1281_v42 = vadd.f32 1.0, %v4272_v40 }
 0x21b   :  { %4277 = vrcp.f32 %v1280_v12 }
 0x21c   :  { %4279 = vrcp.f32 %v1281_v42 }
 0x223   :  { %v4274_v5 = vpop.eup %4273 }
 0x224   :  { %v1288_v47 = vmul.f32 %v4274_v5, %v1286_v11 }
 0x226   :  { %v1290_v24 = vadd.f32 %v1288_v47, %v1254_v44  ;;  %v1565_v44 = vunpack.c.h.bf16 %v4790_v19  ;;  %v1561_v19 = vld [vmem:[#allocation4 + $0x38] ss:$12 sps:$4 sm:$0xff]  }
 0x227   :  { %v4276_v51 = vpop.eup %4275 }
 0x228   :  { %4281 = vtanh.f32 %v1290_v24  ;;  %v1289_v54 = vmul.f32 %v4276_v51, %v1287_v48  ;;  %v4278_v58 = vpop.eup %4277  ;;  %v1568_v48 = vunpack.c.h.bf16 %v4796_v32 }
 0x229   :  { %v4280_v59 = vpop.eup %4279  ;;  %v1294_v61 = vsub.f32 1.0, %v4278_v58  ;;  %v1298_v6 = vmul.f32 %v4278_v58, %v4833_v62 }
 0x22a   :  { %v1291_v56 = vadd.f32 %v1289_v54, %v1257_v36  ;;  %v1295_v0 = vsub.f32 1.0, %v4280_v59  ;;  %v1299_v7 = vmul.f32 %v4280_v59, %v4835_v63 }
 0x22c   :  { %4283 = vtanh.f32 %v1291_v56 }
 0x235   :  { %v4282_v60 = vpop.eup %4281 }
 0x236   :  { %v1296_v2 = vmul.f32 %v4282_v60, %v1294_v61 }
 0x238   :  { %v4910_v38 = vadd.f32 %v1298_v6, %v1296_v2 }
 0x239   :  { %v4284_v3 = vpop.eup %4283 }
 0x23a   :  { %v1297_v4 = vmul.f32 %v4284_v3, %v1295_v0 }
 0x23c   :  { %v4912_v41 = vadd.f32 %v1299_v7, %v1297_v4  ;;  %v1566_v7 = vunpack.c.l.bf16 %v1561_v19 }
 0x23e   :  { %v1302_v43 = vpack.c.bf16 %v4912_v41, %v4910_v38 }
 0x240   :  { %3741 = vst [vmem:[%s5434_s7 + $0x8] sm:$0xff] %v1302_v43   ;;  %1508 = vmatmul.mubr.bf16.vlgmr.msra.gmra.mxu1 %v1302_v43  ;;  %3934 = vmatmul.mubr.bf16.vlgmr.msra.gmra.mxu0 %v1302_v43 }
 0x241   :  { %1819 = vmatprep.mubr.bf16.mxu1 %v4411_v1  ;;  %3953 = vmatprep.mubr.msk.bf16.mxu0 %vm4414_vm0, %v4412_v30 }
 0x242   :  { %1788 = vmatpush1.bf16.msra.mxu1 %v4930_v46  ;;  %3938 = vmatpush3.bf16.msra.mxu0 %v4152_v49 }
 0x243   :  { %3939 = vmatprep.subr.bf16.mxu0 %v4412_v30  ;;  %1789 = vmatprep.subr.bf16.mxu1 %v4940_v50 }
 0x246   :  { %1790 = vmatpush1.bf16.msra.mxu1 %v4946_v52  ;;  %3940 = vmatpush3.bf16.msra.mxu0 %v4156_v53 }
 0x247   :  { %3941 = vmatprep.subr.bf16.mxu0 %v4412_v30  ;;  %1791 = vmatprep.subr.bf16.mxu1 %v4956_v55 }
 0x24a   :  { %1792 = vmatpush1.bf16.msra.mxu1 %v4962_v8  ;;  %3942 = vmatpush3.bf16.msra.mxu0 %v4160_v9 }
 0x24b   :  { %3943 = vmatprep.subr.bf16.mxu0 %v4412_v30  ;;  %1793 = vmatprep.subr.bf16.mxu1 %v4972_v13 }
 0x24e   :  { %1794 = vmatpush1.bf16.msra.mxu1 %v4978_v14  ;;  %3944 = vmatpush3.bf16.msra.mxu0 %v4164_v15  ;;  %v1569_v15 = vunpack.c.h.bf16 %v1561_v19 }
 0x24f   :  { %1795 = vmatprep.subr.bf16.mxu1 %v4987_v16  ;;  %3945 = vmatprep.subr.bf16.mxu0 %v4412_v30 }
 0x252   :  { %1796 = vmatpush1.bf16.msra.mxu1 %v4993_v17  ;;  %3946 = vmatpush3.bf16.msra.mxu0 %v4168_v10 }
 0x253   :  { %1797 = vmatprep.subr.bf16.mxu1 %v5003_v20  ;;  %3947 = vmatprep.subr.bf16.mxu0 %v4412_v30 }
 0x256   :  { %1798 = vmatpush1.bf16.msra.mxu1 %v5009_v21  ;;  %3948 = vmatpush3.bf16.msra.mxu0 %v4172_v22 }
 0x257   :  { %1799 = vmatprep.subr.bf16.mxu1 %v5019_v23  ;;  %3949 = vmatprep.subr.bf16.mxu0 %v4412_v30 }
 0x25a   :  { %1800 = vmatpush1.bf16.msra.mxu1 %v5025_v25  ;;  %3950 = vmatpush3.bf16.msra.mxu0 %v4176_v26 }
 0x25b   :  { %1801 = vmatprep.subr.bf16.mxu1 %v5035_v27  ;;  %3951 = vmatprep.subr.bf16.mxu0 %v4412_v30 }
 0x25e   :  { %1802 = vmatpush1.bf16.msra.mxu1 %v5041_v28  ;;  %3952 = vmatpush3.bf16.msra.mxu0 %v4180_v29 }
 0x25f   :  { %2099 = vmatprep.subr.bf16.mxu1 %v4925_v45  ;;  %3957 = vmatprep.subr.bf16.mxu0 %v4412_v30 }
 0x300   :  { %v1509_v33 = vpop.f32.mrf.mxu1  ;;  %v1552_v34 = vpop.f32.mrf.mxu0 }
 0x301   :  { %v1570_v35 = vadd.f32 %v1564_v31, %v1509_v33  ;;  %v1598_v3 = vadd.f32 %v4827_v18, %v1552_v34 }
 0x302   :  { %v1511_v37 = vpop.f32.mrf.mxu1  ;;  %v3935_v39 = vpop.f32.mrf.mxu0 }
 0x303   :  { %v3476_v40 = vmul.f32 -1.442695, %v1570_v35  ;;  %v1584_v51 = vadd.f32 %v1565_v44, %v1511_v37  ;;  %v4182_v44 = vld [vmem:[%s5431_s2 + $0x98] ss:$12 sps:$4 sm:$0xff]  }
 0x304   :  { %v1513_v11 = vpop.f32.mrf.mxu1  ;;  %v1555_v12 = vpop.f32.mrf.mxu0 }
 0x305   :  { %4285 = vpow2.f32 %v3476_v40  ;;  %v1571_v5 = vadd.f32 %v1567_v57, %v1513_v11  ;;  %v3478_v54 = vmul.f32 -1.442695, %v1584_v51  ;;  %v1599_v53 = vadd.f32 %v4827_v18, %v1555_v12  ;;  %v4186_v51 = vld [vmem:[%s5431_s2 + $0x38] ss:$12 sps:$4 sm:$0xff]  }
 0x306   :  { %v3936_v42 = vpop.f32.mrf.mxu0  ;;  %v1515_v24 = vpop.f32.mrf.mxu1 }
 0x307   :  { %v3477_v47 = vmul.f32 -1.442695, %v1571_v5  ;;  %v1585_v36 = vadd.f32 %v1568_v48, %v1515_v24  ;;  %v4181_v42 = vld [vmem:[%s5431_s2 + $0xb0] ss:$12 sps:$4 sm:$0xff]   ;;  %v4184_v24 = vld [vmem:[%s5431_s2 + $0x68] ss:$12 sps:$4 sm:$0xff]  }
 0x308   :  { %v4185_v48 = vld [vmem:[%s5431_s2 + $0x50] ss:$12 sps:$4 sm:$0xff]  }
 0x309   :  { %4287 = vpow2.f32 %v3477_v47  ;;  %v3479_v56 = vmul.f32 -1.442695, %v1585_v36  ;;  %v4183_v47 = vld [vmem:[%s5431_s2 + $0x80] ss:$12 sps:$4 sm:$0xff]  }
 0x30a   :  { %4289 = vpow2.f32 %v3478_v54  ;;  %v4187_v36 = vld [vmem:[%s5431_s2 + $0x20] ss:$12 sps:$4 sm:$0xff]   ;;  %v4188_v54 = vld [vmem:[%s5431_s2 + $0x8] ss:$12 sps:$4 sm:$0xff]  }
 0x30b   :  { %4291 = vpow2.f32 %v3479_v56  ;;  %v1872_v56 = vld [vmem:[#allocation4 + $0x48] sm:$0xff] }
 0x312   :  { %v4286_v58 = vpop.eup %4285 }
 0x313   :  { %v1578_v59 = vadd.f32 1.0, %v4286_v58  ;;  %v1876_v58 = vunpack.c.l.bf16 %v1872_v56 }
 0x315   :  { %4293 = vrcp.f32 %v1578_v59 }
 0x316   :  { %v4288_v60 = vpop.eup %4287 }
 0x317   :  { %v1579_v61 = vadd.f32 1.0, %v4288_v60  ;;  %v4290_v0 = vpop.eup %4289 }
 0x318   :  { %v4292_v2 = vpop.eup %4291  ;;  %v1592_v4 = vadd.f32 1.0, %v4290_v0 }
 0x319   :  { %4295 = vrcp.f32 %v1579_v61  ;;  %v1593_v6 = vadd.f32 1.0, %v4292_v2  ;;  %v1874_v61 = vld [vmem:[#allocation4 + $0x54] sm:$0xff] }
 0x31a   :  { %4297 = vrcp.f32 %v1592_v4  ;;  %v1879_v4 = vunpack.c.l.bf16 %v1874_v61 }
 0x31b   :  { %4299 = vrcp.f32 %v1593_v6 }
 0x322   :  { %v4294_v32 = vpop.eup %4293 }
 0x323   :  { %v1600_v43 = vmul.f32 %v4294_v32, %v1598_v3 }
 0x325   :  { %v1602_v49 = vadd.f32 %v1600_v43, %v1566_v7 }
 0x326   :  { %v4296_v9 = vpop.eup %4295 }
 0x327   :  { %4301 = vtanh.f32 %v1602_v49  ;;  %v1601_v10 = vmul.f32 %v4296_v9, %v1599_v53  ;;  %v4298_v26 = vpop.eup %4297  ;;  %v1877_v49 = vunpack.c.h.bf16 %v1872_v56 }
 0x328   :  { %v4300_v29 = vpop.eup %4299  ;;  %v1606_v33 = vsub.f32 1.0, %v4298_v26  ;;  %v1610_v40 = vmul.f32 %v4298_v26, %v4910_v38 }
 0x329   :  { %v1603_v22 = vadd.f32 %v1601_v10, %v1569_v15  ;;  %v1607_v34 = vsub.f32 1.0, %v4300_v29  ;;  %v1611_v57 = vmul.f32 %v4300_v29, %v4912_v41  ;;  %v1880_v15 = vunpack.c.h.bf16 %v1874_v61 }
 0x32b   :  { %4303 = vtanh.f32 %v1603_v22 }
 0x334   :  { %v4302_v31 = vpop.eup %4301 }
 0x335   :  { %v1608_v35 = vmul.f32 %v4302_v31, %v1606_v33 }
 0x337   :  { %v5059_v11 = vadd.f32 %v1610_v40, %v1608_v35  ;;  %v1873_v40 = vld [vmem:[#allocation4 + $0x50] ss:$12 sps:$4 sm:$0xff]  }
 0x338   :  { %v4304_v37 = vpop.eup %4303 }
 0x339   :  { %v1609_v39 = vmul.f32 %v4304_v37, %v1607_v34 }
 0x33b   :  { %v5061_v12 = vadd.f32 %v1611_v57, %v1609_v39 }
 0x33d   :  { %v1614_v5 = vpack.c.bf16 %v5061_v12, %v5059_v11 }
 0x33f   :  { %3742 = vst [vmem:[%s5434_s7 + $0x10] sm:$0xff] %v1614_v5   ;;  %1820 = vmatmul.mubr.bf16.vlgmr.msra.gmra.mxu1 %v1614_v5  ;;  %3954 = vmatmul.mubr.bf16.vlgmr.msra.gmra.mxu0 %v1614_v5 }
 0x340   :  { %2100 = vmatpush1.bf16.msra.mxu1 %v4930_v46  ;;  %2131 = vmatprep.mubr.bf16.mxu1 %v4411_v1 }
 0x341   :  { %2101 = vmatprep.subr.bf16.mxu1 %v4940_v50  ;;  %3973 = vmatprep.mubr.msk.bf16.mxu0 %vm4414_vm0, %v4412_v30 }
 0x342   :  { %3958 = vmatpush3.bf16.msra.mxu0 %v4181_v42 }
 0x343   :  { %3959 = vmatprep.subr.bf16.mxu0 %v4412_v30 }
 0x344   :  { %2102 = vmatpush1.bf16.msra.mxu1 %v4946_v52 }
 0x345   :  { %2103 = vmatprep.subr.bf16.mxu1 %v4956_v55 }
 0x346   :  { %3960 = vmatpush3.bf16.msra.mxu0 %v4182_v44 }
 0x347   :  { %3961 = vmatprep.subr.bf16.mxu0 %v4412_v30 }
 0x348   :  { %2104 = vmatpush1.bf16.msra.mxu1 %v4962_v8 }
 0x349   :  { %2105 = vmatprep.subr.bf16.mxu1 %v4972_v13 }
 0x34a   :  { %3962 = vmatpush3.bf16.msra.mxu0 %v4183_v47  ;;  %v1878_v47 = vunpack.c.l.bf16 %v1873_v40 }
 0x34b   :  { %3963 = vmatprep.subr.bf16.mxu0 %v4412_v30 }
 0x34c   :  { %2106 = vmatpush1.bf16.msra.mxu1 %v4978_v14 }
 0x34d   :  { %2107 = vmatprep.subr.bf16.mxu1 %v4987_v16 }
 0x34e   :  { %3964 = vmatpush3.bf16.msra.mxu0 %v4184_v24 }
 0x34f   :  { %3965 = vmatprep.subr.bf16.mxu0 %v4412_v30 }
 0x350   :  { %2108 = vmatpush1.bf16.msra.mxu1 %v4993_v17 }
 0x351   :  { %2109 = vmatprep.subr.bf16.mxu1 %v5003_v20 }
 0x352   :  { %3966 = vmatpush3.bf16.msra.mxu0 %v4185_v48 }
 0x353   :  { %3967 = vmatprep.subr.bf16.mxu0 %v4412_v30 }
 0x354   :  { %2110 = vmatpush1.bf16.msra.mxu1 %v5009_v21 }
 0x355   :  { %2111 = vmatprep.subr.bf16.mxu1 %v5019_v23 }
 0x356   :  { %3968 = vmatpush3.bf16.msra.mxu0 %v4186_v51 }
 0x357   :  { %3969 = vmatprep.subr.bf16.mxu0 %v4412_v30 }
 0x358   :  { %2112 = vmatpush1.bf16.msra.mxu1 %v5025_v25 }
 0x359   :  { %2113 = vmatprep.subr.bf16.mxu1 %v5035_v27 }
 0x35a   :  { %3970 = vmatpush3.bf16.msra.mxu0 %v4187_v36 }
 0x35b   :  { %3971 = vmatprep.subr.bf16.mxu0 %v4412_v30 }
 0x35c   :  { %2114 = vmatpush1.bf16.msra.mxu1 %v5041_v28 }
 0x35d   :  { %2411 = vmatprep.subr.bf16.mxu1 %v4925_v45 }
 0x35e   :  { %3972 = vmatpush3.bf16.msra.mxu0 %v4188_v54  ;;  %v1881_v54 = vunpack.c.h.bf16 %v1873_v40 }
 0x35f   :  { %3977 = vmatprep.subr.bf16.mxu0 %v4412_v30 }
 0x3ff   :  { %v1821_v59 = vpop.f32.mrf.mxu1  ;;  %v1864_v60 = vpop.f32.mrf.mxu0 }
 0x400   :  { %v1882_v0 = vadd.f32 %v1876_v58, %v1821_v59  ;;  %v1910_v57 = vadd.f32 %v4827_v18, %v1864_v60 }
 0x401   :  { %v1823_v2 = vpop.f32.mrf.mxu1  ;;  %v3955_v19 = vpop.f32.mrf.mxu0 }
 0x402   :  { %v3508_v3 = vmul.f32 -1.442695, %v1882_v0  ;;  %v1896_v10 = vadd.f32 %v1877_v49, %v1823_v2 }
 0x403   :  { %v1825_v32 = vpop.f32.mrf.mxu1  ;;  %v1867_v6 = vpop.f32.mrf.mxu0 }
 0x404   :  { %4305 = vpow2.f32 %v3508_v3  ;;  %v1883_v7 = vadd.f32 %v1879_v4, %v1825_v32  ;;  %v3510_v26 = vmul.f32 -1.442695, %v1896_v10  ;;  %v1911_v51 = vadd.f32 %v4827_v18, %v1867_v6  ;;  %v4193_v10 = vld [vmem:[%s5431_s2 + $0x50] ss:$12 sps:$4 sm:$0xff]  }
 0x405   :  { %v3956_v43 = vpop.f32.mrf.mxu0  ;;  %v1827_v9 = vpop.f32.mrf.mxu1 }
 0x406   :  { %v3509_v53 = vmul.f32 -1.442695, %v1883_v7  ;;  %v1897_v22 = vadd.f32 %v1880_v15, %v1827_v9  ;;  %v4190_v9 = vld [vmem:[%s5431_s2 + $0x98] ss:$12 sps:$4 sm:$0xff]   ;;  %v4191_v15 = vld [vmem:[%s5431_s2 + $0x80] ss:$12 sps:$4 sm:$0xff]  }
 0x408   :  { %4307 = vpow2.f32 %v3509_v53  ;;  %v3511_v29 = vmul.f32 -1.442695, %v1897_v22  ;;  %v4189_v53 = vld [vmem:[%s5431_s2 + $0xb0] ss:$12 sps:$4 sm:$0xff]   ;;  %v4194_v22 = vld [vmem:[%s5431_s2 + $0x38] ss:$12 sps:$4 sm:$0xff]  }
 0x409   :  { %4309 = vpow2.f32 %v3510_v26  ;;  %v4195_v26 = vld [vmem:[%s5431_s2 + $0x20] ss:$12 sps:$4 sm:$0xff]  }
 0x40a   :  { %4311 = vpow2.f32 %v3511_v29  ;;  %v4196_v29 = vld [vmem:[%s5431_s2 + $0x8] ss:$12 sps:$4 sm:$0xff]  }
 0x411   :  { %v4306_v31 = vpop.eup %4305 }
 0x412   :  { %v1890_v33 = vadd.f32 1.0, %v4306_v31  ;;  %v2184_v31 = vld [vmem:[#allocation4 + $0x60] sm:$0xff] }
 0x414   :  { %4313 = vrcp.f32 %v1890_v33  ;;  %v2188_v33 = vunpack.c.l.bf16 %v2184_v31 }
 0x415   :  { %v4308_v34 = vpop.eup %4307 }
 0x416   :  { %v1891_v35 = vadd.f32 1.0, %v4308_v34  ;;  %v4310_v37 = vpop.eup %4309 }
 0x417   :  { %v4312_v39 = vpop.eup %4311  ;;  %v1904_v5 = vadd.f32 1.0, %v4310_v37  ;;  %v2186_v37 = vld [vmem:[#allocation4 + $0x6c] sm:$0xff] }
 0x418   :  { %4315 = vrcp.f32 %v1891_v35  ;;  %v1905_v44 = vadd.f32 1.0, %v4312_v39 }
 0x419   :  { %4317 = vrcp.f32 %v1904_v5 }
 0x41a   :  { %4319 = vrcp.f32 %v1905_v44 }
 0x421   :  { %v4314_v42 = vpop.eup %4313 }
 0x422   :  { %v1912_v24 = vmul.f32 %v4314_v42, %v1910_v57  ;;  %v2191_v42 = vunpack.c.l.bf16 %v2186_v37 }
 0x424   :  { %v1914_v48 = vadd.f32 %v1912_v24, %v1878_v47 }
 0x425   :  { %v4316_v36 = vpop.eup %4315 }
 0x426   :  { %4321 = vtanh.f32 %v1914_v48  ;;  %v1913_v56 = vmul.f32 %v4316_v36, %v1911_v51  ;;  %v4318_v59 = vpop.eup %4317  ;;  %v2189_v51 = vunpack.c.h.bf16 %v2184_v31 }
 0x427   :  { %v4320_v61 = vpop.eup %4319  ;;  %v1918_v60 = vsub.f32 1.0, %v4318_v59  ;;  %v1922_v32 = vmul.f32 %v4318_v59, %v5059_v11 }
 0x428   :  { %v1915_v58 = vadd.f32 %v1913_v56, %v1881_v54  ;;  %v1919_v2 = vsub.f32 1.0, %v4320_v61  ;;  %v1923_v7 = vmul.f32 %v4320_v61, %v5061_v12  ;;  %v2192_v56 = vunpack.c.h.bf16 %v2186_v37 }
 0x42a   :  { %4323 = vtanh.f32 %v1915_v58 }
 0x433   :  { %v4322_v0 = vpop.eup %4321 }
 0x434   :  { %v1920_v19 = vmul.f32 %v4322_v0, %v1918_v60 }
 0x436   :  { %v5123_v6 = vadd.f32 %v1922_v32, %v1920_v19 }
 0x437   :  { %v4324_v3 = vpop.eup %4323 }
 0x438   :  { %v1921_v4 = vmul.f32 %v4324_v3, %v1919_v2 }
 0x43a   :  { %v5125_v43 = vadd.f32 %v1923_v7, %v1921_v4  ;;  %v2185_v7 = vld [vmem:[#allocation4 + $0x68] ss:$12 sps:$4 sm:$0xff]  }
 0x43b   :  { %v2193_v31 = vunpack.c.h.bf16 %v2185_v7 }
 0x43c   :  { %v1926_v49 = vpack.c.bf16 %v5125_v43, %v5123_v6 }
 0x43e   :  { %3743 = vst [vmem:[%s5434_s7 + $0x18] sm:$0xff] %v1926_v49   ;;  %2132 = vmatmul.mubr.bf16.vlgmr.msra.gmra.mxu1 %v1926_v49  ;;  %3974 = vmatmul.mubr.bf16.vlgmr.msra.gmra.mxu0 %v1926_v49 }
 0x43f   :  { %2412 = vmatpush1.bf16.msra.mxu1 %v4930_v46  ;;  %2443 = vmatprep.mubr.bf16.mxu1 %v4411_v1 }
 0x440   :  { %2413 = vmatprep.subr.bf16.mxu1 %v4940_v50  ;;  %3993 = vmatprep.mubr.msk.bf16.mxu0 %vm4414_vm0, %v4412_v30 }
 0x441   :  { %3978 = vmatpush3.bf16.msra.mxu0 %v4189_v53 }
 0x442   :  { %3979 = vmatprep.subr.bf16.mxu0 %v4412_v30 }
 0x443   :  { %2414 = vmatpush1.bf16.msra.mxu1 %v4946_v52 }
 0x444   :  { %2415 = vmatprep.subr.bf16.mxu1 %v4956_v55 }
 0x445   :  { %3980 = vmatpush3.bf16.msra.mxu0 %v4190_v9 }
 0x446   :  { %3981 = vmatprep.subr.bf16.mxu0 %v4412_v30 }
 0x447   :  { %2416 = vmatpush1.bf16.msra.mxu1 %v4962_v8 }
 0x448   :  { %2417 = vmatprep.subr.bf16.mxu1 %v4972_v13 }
 0x449   :  { %3982 = vmatpush3.bf16.msra.mxu0 %v4191_v15 }
 0x44a   :  { %3983 = vmatprep.subr.bf16.mxu0 %v4412_v30 }
 0x44b   :  { %2418 = vmatpush1.bf16.msra.mxu1 %v4978_v14 }
 0x44c   :  { %2419 = vmatprep.subr.bf16.mxu1 %v4987_v16 }
 0x44f   :  { %2420 = vmatpush1.bf16.msra.mxu1 %v4993_v17 }
 0x450   :  { %2421 = vmatprep.subr.bf16.mxu1 %v5003_v20 }
 0x453   :  { %2422 = vmatpush1.bf16.msra.mxu1 %v5009_v21 }
 0x454   :  { %2423 = vmatprep.subr.bf16.mxu1 %v5019_v23 }
 0x457   :  { %2424 = vmatpush1.bf16.msra.mxu1 %v5025_v25 }
 0x458   :  { %2425 = vmatprep.subr.bf16.mxu1 %v5035_v27 }
 0x45b   :  { %2426 = vmatpush1.bf16.msra.mxu1 %v5041_v28 }
 0x45c   :  { %2723 = vmatprep.subr.bf16.mxu1 %v4925_v45  ;;  %v4192_v45 = vld [vmem:[%s5431_s2 + $0x68] ss:$12 sps:$4 sm:$0xff]  }
 0x45d   :  { %3984 = vmatpush3.bf16.msra.mxu0 %v4192_v45  ;;  %v2190_v45 = vunpack.c.l.bf16 %v2185_v7 }
 0x45e   :  { %3985 = vmatprep.subr.bf16.mxu0 %v4412_v30 }
 0x461   :  { %3986 = vmatpush3.bf16.msra.mxu0 %v4193_v10 }
 0x462   :  { %3987 = vmatprep.subr.bf16.mxu0 %v4412_v30 }
 0x465   :  { %3988 = vmatpush3.bf16.msra.mxu0 %v4194_v22 }
 0x466   :  { %3989 = vmatprep.subr.bf16.mxu0 %v4412_v30 }
 0x469   :  { %3990 = vmatpush3.bf16.msra.mxu0 %v4195_v26 }
 0x46a   :  { %3991 = vmatprep.subr.bf16.mxu0 %v4412_v30 }
 0x46d   :  { %3992 = vmatpush3.bf16.msra.mxu0 %v4196_v29 }
 0x46e   :  { %3997 = vmatprep.subr.bf16.mxu0 %v4412_v30 }
 0x4fe   :  { %v2133_v34 = vpop.f32.mrf.mxu1  ;;  %v2176_v35 = vpop.f32.mrf.mxu0 }
 0x4ff   :  { %v2194_v39 = vadd.f32 %v2188_v33, %v2133_v34  ;;  %v2222_v49 = vadd.f32 %v4827_v18, %v2176_v35 }
 0x500   :  { %v2135_v40 = vpop.f32.mrf.mxu1  ;;  %v3975_v57 = vpop.f32.mrf.mxu0 }
 0x501   :  { %v3540_v5 = vmul.f32 -1.442695, %v2194_v39  ;;  %v2208_v58 = vadd.f32 %v2189_v51, %v2135_v40 }
 0x502   :  { %v2137_v44 = vpop.f32.mrf.mxu1  ;;  %v2179_v47 = vpop.f32.mrf.mxu0 }
 0x503   :  { %4325 = vpow2.f32 %v3540_v5  ;;  %v2195_v24 = vadd.f32 %v2191_v42, %v2137_v44  ;;  %v3542_v61 = vmul.f32 -1.442695, %v2208_v58  ;;  %v2223_v26 = vadd.f32 %v4827_v18, %v2179_v47 }
 0x504   :  { %v3976_v48 = vpop.f32.mrf.mxu0  ;;  %v2139_v54 = vpop.f32.mrf.mxu1 }
 0x505   :  { %v3541_v36 = vmul.f32 -1.442695, %v2195_v24  ;;  %v2209_v59 = vadd.f32 %v2192_v56, %v2139_v54 }
 0x507   :  { %4327 = vpow2.f32 %v3541_v36  ;;  %v3543_v0 = vmul.f32 -1.442695, %v2209_v59 }
 0x508   :  { %4329 = vpow2.f32 %v3542_v61 }
 0x509   :  { %4331 = vpow2.f32 %v3543_v0 }
 0x510   :  { %v4326_v60 = vpop.eup %4325 }
 0x511   :  { %v2202_v2 = vadd.f32 1.0, %v4326_v60 }
 0x513   :  { %4333 = vrcp.f32 %v2202_v2 }
 0x514   :  { %v4328_v19 = vpop.eup %4327 }
 0x515   :  { %v2203_v3 = vadd.f32 1.0, %v4328_v19  ;;  %v4330_v4 = vpop.eup %4329 }
 0x516   :  { %v4332_v32 = vpop.eup %4331  ;;  %v2216_v53 = vadd.f32 1.0, %v4330_v4 }
 0x517   :  { %4335 = vrcp.f32 %v2203_v3  ;;  %v2217_v15 = vadd.f32 1.0, %v4332_v32 }
 0x518   :  { %4337 = vrcp.f32 %v2216_v53 }
 0x519   :  { %4339 = vrcp.f32 %v2217_v15 }
 0x520   :  { %v4334_v9 = vpop.eup %4333 }
 0x521   :  { %v2224_v10 = vmul.f32 %v4334_v9, %v2222_v49 }
 0x523   :  { %v2226_v22 = vadd.f32 %v2224_v10, %v2190_v45 }
 0x524   :  { %v4336_v29 = vpop.eup %4335 }
 0x525   :  { %4341 = vtanh.f32 %v2226_v22  ;;  %v2225_v33 = vmul.f32 %v4336_v29, %v2223_v26  ;;  %v4338_v37 = vpop.eup %4337  ;;  %v2497_v26 = vld [vmem:[#allocation4 + $0x80] ss:$12 sps:$4 sm:$0xff]  }
 0x526   :  { %v4340_v39 = vpop.eup %4339  ;;  %v2230_v35 = vsub.f32 1.0, %v4338_v37  ;;  %v2234_v24 = vmul.f32 %v4338_v37, %v5123_v6  ;;  %v5249_v29 = vld [vmem:[%s5433_s4] ss:$0 sm:$0xff] }
 0x527   :  { %v2227_v34 = vadd.f32 %v2225_v33, %v2193_v31  ;;  %v2231_v57 = vsub.f32 1.0, %v4340_v39  ;;  %v2235_v48 = vmul.f32 %v4340_v39, %v5125_v43  ;;  %v2502_v39 = vunpack.c.l.bf16 %v2497_v26 }
 0x529   :  { %4343 = vtanh.f32 %v2227_v34 }
 0x532   :  { %v4342_v40 = vpop.eup %4341 }
 0x533   :  { %v2232_v5 = vmul.f32 %v4342_v40, %v2230_v35 }
 0x535   :  { %v5187_v18 = vadd.f32 %v2234_v24, %v2232_v5 }
 0x536   :  { %v4344_v42 = vpop.eup %4343 }
 0x537   :  { %v2233_v44 = vmul.f32 %v4344_v42, %v2231_v57  ;;  %v2505_v42 = vunpack.c.h.bf16 %v2497_v26 }
 0x539   :  { %v5189_v47 = vadd.f32 %v2235_v48, %v2233_v44 }
 0x53b   :  { %v2238_v51 = vpack.c.bf16 %v5189_v47, %v5187_v18 }
 0x53d   :  { %3744 = vst [vmem:[%s5434_s7 + $0x20] sm:$0xff] %v2238_v51   ;;  %2444 = vmatmul.mubr.bf16.vlgmr.msra.gmra.mxu1 %v2238_v51  ;;  %3994 = vmatmul.mubr.bf16.vlgmr.msra.gmra.mxu0 %v2238_v51 }
 0x53e   :  { %2724 = vmatpush1.bf16.msra.mxu1 %v4930_v46  ;;  %2755 = vmatprep.mubr.bf16.mxu1 %v4411_v1  ;;  %v4197_v46 = vld [vmem:[%s5431_s2 + $0xb0] ss:$12 sps:$4 sm:$0xff]  }
 0x53f   :  { %2725 = vmatprep.subr.bf16.mxu1 %v4940_v50  ;;  %4013 = vmatprep.mubr.msk.bf16.mxu0 %vm4414_vm0, %v4412_v30  ;;  %v4198_v50 = vld [vmem:[%s5431_s2 + $0x98] ss:$12 sps:$4 sm:$0xff]  }
 0x540   :  { %3998 = vmatpush3.bf16.msra.mxu0 %v4197_v46 }
 0x541   :  { %3999 = vmatprep.subr.bf16.mxu0 %v4412_v30 }
 0x542   :  { %2726 = vmatpush1.bf16.msra.mxu1 %v4946_v52  ;;  %v4199_v52 = vld [vmem:[%s5431_s2 + $0x80] ss:$12 sps:$4 sm:$0xff]  }
 0x543   :  { %2727 = vmatprep.subr.bf16.mxu1 %v4956_v55  ;;  %v4200_v55 = vld [vmem:[%s5431_s2 + $0x68] ss:$12 sps:$4 sm:$0xff]  }
 0x544   :  { %4000 = vmatpush3.bf16.msra.mxu0 %v4198_v50 }
 0x545   :  { %4001 = vmatprep.subr.bf16.mxu0 %v4412_v30 }
 0x546   :  { %2728 = vmatpush1.bf16.msra.mxu1 %v4962_v8  ;;  %v4201_v8 = vld [vmem:[%s5431_s2 + $0x50] ss:$12 sps:$4 sm:$0xff]  }
 0x547   :  { %2729 = vmatprep.subr.bf16.mxu1 %v4972_v13  ;;  %v4202_v13 = vld [vmem:[%s5431_s2 + $0x38] ss:$12 sps:$4 sm:$0xff]  }
 0x548   :  { %4002 = vmatpush3.bf16.msra.mxu0 %v4199_v52 }
 0x549   :  { %4003 = vmatprep.subr.bf16.mxu0 %v4412_v30 }
 0x54a   :  { %2730 = vmatpush1.bf16.msra.mxu1 %v4978_v14  ;;  %v4203_v14 = vld [vmem:[%s5431_s2 + $0x20] ss:$12 sps:$4 sm:$0xff]  }
 0x54b   :  { %2731 = vmatprep.subr.bf16.mxu1 %v4987_v16  ;;  %v4204_v16 = vld [vmem:[%s5431_s2 + $0x8] ss:$12 sps:$4 sm:$0xff]  }
 0x54c   :  { %4004 = vmatpush3.bf16.msra.mxu0 %v4200_v55 }
 0x54d   :  { %4005 = vmatprep.subr.bf16.mxu0 %v4412_v30 }
 0x54e   :  { %2732 = vmatpush1.bf16.msra.mxu1 %v4993_v17  ;;  %v2496_v17 = vld [vmem:[#allocation4 + $0x78] sm:$0xff] }
 0x54f   :  { %2733 = vmatprep.subr.bf16.mxu1 %v5003_v20  ;;  %v2500_v20 = vunpack.c.l.bf16 %v2496_v17  ;;  %v2501_v60 = vunpack.c.h.bf16 %v2496_v17 }
 0x550   :  { %4006 = vmatpush3.bf16.msra.mxu0 %v4201_v8 }
 0x551   :  { %4007 = vmatprep.subr.bf16.mxu0 %v4412_v30 }
 0x552   :  { %2734 = vmatpush1.bf16.msra.mxu1 %v5009_v21 }
 0x553   :  { %2735 = vmatprep.subr.bf16.mxu1 %v5019_v23 }
 0x554   :  { %4008 = vmatpush3.bf16.msra.mxu0 %v4202_v13 }
 0x555   :  { %4009 = vmatprep.subr.bf16.mxu0 %v4412_v30 }
 0x556   :  { %2736 = vmatpush1.bf16.msra.mxu1 %v5025_v25  ;;  %v2498_v25 = vld [vmem:[#allocation4 + $0x84] sm:$0xff] }
 0x557   :  { %2737 = vmatprep.subr.bf16.mxu1 %v5035_v27  ;;  %v2503_v56 = vunpack.c.l.bf16 %v2498_v25  ;;  %v2504_v3 = vunpack.c.h.bf16 %v2498_v25  ;;  %v4205_v25 = vld [vmem:[%s5431_s2 + $0xa8] ss:$12 sps:$4 sm:$0xff]  }
 0x558   :  { %4010 = vmatpush3.bf16.msra.mxu0 %v4203_v14 }
 0x559   :  { %4011 = vmatprep.subr.bf16.mxu0 %v4412_v30 }
 0x55a   :  { %2738 = vmatpush1.bf16.msra.mxu1 %v5041_v28 }
 0x55c   :  { %4012 = vmatpush3.bf16.msra.mxu0 %v4204_v16 }
 0x55d   :  { %4017 = vmatprep.subr.bf16.mxu0 %v4412_v30 }
 0x5fd   :  { %v2445_v21 = vpop.f32.mrf.mxu1  ;;  %v2488_v23 = vpop.f32.mrf.mxu0 }
 0x5fe   :  { %v2506_v27 = vadd.f32 %v2500_v20, %v2445_v21  ;;  %v2534_v31 = vadd.f32 %v5249_v29, %v2488_v23  ;;  %v4207_v23 = vld [vmem:[%s5431_s2 + $0xac] ss:$12 sps:$4 sm:$0xff]  }
 0x5ff   :  { %v2447_v28 = vpop.f32.mrf.mxu1  ;;  %v3995_v36 = vpop.f32.mrf.mxu0  ;;  %3035 = vmatprep.subr.bf16.mxu1 %v4207_v23 }
 0x600   :  { %v3572_v54 = vmul.f32 -1.442695, %v2506_v27  ;;  %v2520_v4 = vadd.f32 %v2501_v60, %v2447_v28  ;;  %v4208_v27 = vld [vmem:[%s5431_s2 + $0xb0] ss:$12 sps:$4 sm:$0xff]   ;;  %v4212_v36 = vld [vmem:[%s5431_s2 + $0x98] ss:$12 sps:$4 sm:$0xff]  }
 0x601   :  { %v2449_v58 = vpop.f32.mrf.mxu1  ;;  %v2491_v59 = vpop.f32.mrf.mxu0  ;;  %v4209_v28 = vld [vmem:[%s5431_s2 + $0x90] ss:$12 sps:$4 sm:$0xff]   ;;  %v4223_v60 = vld [vmem:[%s5431_s2 + $0x4c] ss:$12 sps:$4 sm:$0xff]  }
 0x602   :  { %4345 = vpow2.f32 %v3572_v54  ;;  %v2507_v61 = vadd.f32 %v2503_v56, %v2449_v58  ;;  %v3574_v7 = vmul.f32 -1.442695, %v2520_v4  ;;  %v2535_v57 = vadd.f32 %v5249_v29, %v2491_v59  ;;  %v4215_v54 = vld [vmem:[%s5431_s2 + $0x7c] ss:$12 sps:$4 sm:$0xff]   ;;  %v4213_v56 = vld [vmem:[%s5431_s2 + $0x78] ss:$12 sps:$4 sm:$0xff]  }
 0x603   :  { %v3996_v0 = vpop.f32.mrf.mxu0  ;;  %v2451_v19 = vpop.f32.mrf.mxu1  ;;  %v4216_v58 = vld [vmem:[%s5431_s2 + $0x80] ss:$12 sps:$4 sm:$0xff]   ;;  %v4219_v59 = vld [vmem:[%s5431_s2 + $0x64] ss:$12 sps:$4 sm:$0xff]  }
 0x604   :  { %v3573_v2 = vmul.f32 -1.442695, %v2507_v61  ;;  %v2521_v32 = vadd.f32 %v2504_v3, %v2451_v19  ;;  %v4217_v61 = vld [vmem:[%s5431_s2 + $0x60] ss:$12 sps:$4 sm:$0xff]   ;;  %v4220_v0 = vld [vmem:[%s5431_s2 + $0x68] ss:$12 sps:$4 sm:$0xff]  }
 0x605   :  { %v4224_v19 = vld [vmem:[%s5431_s2 + $0x50] ss:$12 sps:$4 sm:$0xff]   ;;  %v4227_v3 = vld [vmem:[%s5431_s2 + $0x34] ss:$12 sps:$4 sm:$0xff]  }
 0x606   :  { %4347 = vpow2.f32 %v3573_v2  ;;  %v3575_v49 = vmul.f32 -1.442695, %v2521_v32  ;;  %v4221_v2 = vld [vmem:[%s5431_s2 + $0x48] ss:$12 sps:$4 sm:$0xff]   ;;  %v4225_v4 = vld [vmem:[%s5431_s2 + $0x30] ss:$12 sps:$4 sm:$0xff]  }
 0x607   :  { %4349 = vpow2.f32 %v3574_v7  ;;  %v4228_v32 = vld [vmem:[%s5431_s2 + $0x38] ss:$12 sps:$4 sm:$0xff]   ;;  %v4231_v7 = vld [vmem:[%s5431_s2 + $0x1c] ss:$12 sps:$4 sm:$0xff]  }
 0x608   :  { %4351 = vpow2.f32 %v3575_v49  ;;  %v4229_v49 = vld [vmem:[%s5431_s2 + $0x18] ss:$12 sps:$4 sm:$0xff]  }
 0x60f   :  { %v4346_v53 = vpop.eup %4345 }
 0x610   :  { %v2514_v9 = vadd.f32 1.0, %v4346_v53  ;;  %v4232_v53 = vld [vmem:[%s5431_s2 + $0x20] ss:$12 sps:$4 sm:$0xff]  }
 0x612   :  { %4353 = vrcp.f32 %v2514_v9  ;;  %v4235_v9 = vld [vmem:[%s5431_s2 + $0x4] ss:$12 sps:$4 sm:$0xff]  }
 0x613   :  { %v4348_v15 = vpop.eup %4347 }
 0x614   :  { %v2515_v45 = vadd.f32 1.0, %v4348_v15  ;;  %v4350_v10 = vpop.eup %4349  ;;  %v4233_v15 = vld [vmem:[%s5431_s2] ss:$12 sps:$4 sm:$0xff]  }
 0x615   :  { %v4352_v22 = vpop.eup %4351  ;;  %v2528_v33 = vadd.f32 1.0, %v4350_v10  ;;  %v2808_v10 = vld [vmem:[#allocation4 + $0x90] sm:$0xff] }
 0x616   :  { %4355 = vrcp.f32 %v2515_v45  ;;  %v2529_v37 = vadd.f32 1.0, %v4352_v22  ;;  %v4236_v45 = vld [vmem:[%s5431_s2 + $0x8] ss:$12 sps:$4 sm:$0xff]   ;;  %v2812_v22 = vunpack.c.l.bf16 %v2808_v10 }
 0x617   :  { %4357 = vrcp.f32 %v2528_v33  ;;  %v2810_v33 = vld [vmem:[#allocation4 + $0x9c] sm:$0xff] }
 0x618   :  { %4359 = vrcp.f32 %v2529_v37 }
 0x61f   :  { %v4354_v34 = vpop.eup %4353 }
 0x620   :  { %v2536_v40 = vmul.f32 %v4354_v34, %v2534_v31 }
 0x622   :  { %v2538_v35 = vadd.f32 %v2536_v40, %v2502_v39 }
 0x623   :  { %v4356_v5 = vpop.eup %4355 }
 0x624   :  { %4361 = vtanh.f32 %v2538_v35  ;;  %v2537_v44 = vmul.f32 %v4356_v5, %v2535_v57  ;;  %v4358_v48 = vpop.eup %4357  ;;  %v2815_v35 = vunpack.c.l.bf16 %v2810_v33 }
 0x625   :  { %v4360_v51 = vpop.eup %4359  ;;  %v2542_v50 = vsub.f32 1.0, %v4358_v48  ;;  %v2546_v14 = vmul.f32 %v4358_v48, %v5187_v18 }
 0x626   :  { %v2539_v24 = vadd.f32 %v2537_v44, %v2505_v42  ;;  %v2543_v52 = vsub.f32 1.0, %v4360_v51  ;;  %v2547_v16 = vmul.f32 %v4360_v51, %v5189_v47 }
 0x628   :  { %4363 = vtanh.f32 %v2539_v24  ;;  %v2813_v24 = vunpack.c.h.bf16 %v2808_v10 }
 0x631   :  { %v4362_v46 = vpop.eup %4361 }
 0x632   :  { %v2544_v55 = vmul.f32 %v4362_v46, %v2542_v50  ;;  %v2816_v46 = vunpack.c.h.bf16 %v2810_v33  ;;  %v4237_v33 = vld [vmem:[%s5435_s5 + $0x38] sm:$0xff]  }
 0x634   :  { %v5255_v17 = vadd.f32 %v2546_v14, %v2544_v55 }
 0x635   :  { %v4364_v8 = vpop.eup %4363 }
 0x636   :  { %v2545_v13 = vmul.f32 %v4364_v8, %v2543_v52 }
 0x638   :  { %v5257_v20 = vadd.f32 %v2547_v16, %v2545_v13 }
 0x63a   :  { %v2550_v21 = vpack.c.bf16 %v5257_v20, %v5255_v17 }
 0x63c   :  { %3745 = vst [vmem:[%s5434_s7 + $0x28] sm:$0xff] %v2550_v21   ;;  %2756 = vmatmul.mubr.bf16.vlgmr.msra.gmra.mxu1 %v2550_v21  ;;  %4014 = vmatmul.mubr.bf16.vlgmr.msra.gmra.mxu0 %v2550_v21 }
 0x63d   :  { %3067 = vmatprep.mubr.bf16.mxu1 %v4411_v1  ;;  %4033 = vmatprep.mubr.msk.bf16.mxu0 %vm4414_vm0, %v4412_v30  ;;  %v4211_v1 = vld [vmem:[%s5431_s2 + $0x94] ss:$12 sps:$4 sm:$0xff]  }
 0x63e   :  { %3036 = vmatpush1.bf16.msra.mxu1 %v4205_v25  ;;  %4018 = vmatpush3.bf16.msra.mxu0 %v4208_v27  ;;  %v2809_v27 = vld [vmem:[#allocation4 + $0x98] ss:$12 sps:$4 sm:$0xff]  }
 0x63f   :  { %4019 = vmatprep.subr.bf16.mxu0 %v4412_v30  ;;  %3037 = vmatprep.subr.bf16.mxu1 %v4211_v1 }
 0x642   :  { %3038 = vmatpush1.bf16.msra.mxu1 %v4209_v28  ;;  %4020 = vmatpush3.bf16.msra.mxu0 %v4212_v36 }
 0x643   :  { %4021 = vmatprep.subr.bf16.mxu0 %v4412_v30  ;;  %3039 = vmatprep.subr.bf16.mxu1 %v4215_v54 }
 0x646   :  { %3040 = vmatpush1.bf16.msra.mxu1 %v4213_v56  ;;  %4022 = vmatpush3.bf16.msra.mxu0 %v4216_v58  ;;  %v2814_v56 = vunpack.c.l.bf16 %v2809_v27 }
 0x647   :  { %4023 = vmatprep.subr.bf16.mxu0 %v4412_v30  ;;  %3041 = vmatprep.subr.bf16.mxu1 %v4219_v59 }
 0x64a   :  { %3042 = vmatpush1.bf16.msra.mxu1 %v4217_v61  ;;  %4024 = vmatpush3.bf16.msra.mxu0 %v4220_v0 }
 0x64b   :  { %3043 = vmatprep.subr.bf16.mxu1 %v4223_v60  ;;  %4025 = vmatprep.subr.bf16.mxu0 %v4412_v30  ;;  %v2817_v60 = vunpack.c.h.bf16 %v2809_v27 }
 0x64e   :  { %3044 = vmatpush1.bf16.msra.mxu1 %v4221_v2  ;;  %4026 = vmatpush3.bf16.msra.mxu0 %v4224_v19 }
 0x64f   :  { %3045 = vmatprep.subr.bf16.mxu1 %v4227_v3  ;;  %4027 = vmatprep.subr.bf16.mxu0 %v4412_v30 }
 0x652   :  { %3046 = vmatpush1.bf16.msra.mxu1 %v4225_v4  ;;  %4028 = vmatpush3.bf16.msra.mxu0 %v4228_v32 }
 0x653   :  { %3047 = vmatprep.subr.bf16.mxu1 %v4231_v7  ;;  %4029 = vmatprep.subr.bf16.mxu0 %v4412_v30 }
 0x656   :  { %3048 = vmatpush1.bf16.msra.mxu1 %v4229_v49  ;;  %4030 = vmatpush3.bf16.msra.mxu0 %v4232_v53 }
 0x657   :  { %3049 = vmatprep.subr.bf16.mxu1 %v4235_v9  ;;  %4031 = vmatprep.subr.bf16.mxu0 %v4412_v30 }
 0x65a   :  { %3050 = vmatpush1.bf16.msra.mxu1 %v4233_v15  ;;  %4032 = vmatpush3.bf16.msra.mxu0 %v4236_v45 }
 0x65b   :  { %4037 = vmatprep.subr.bf16.mxu1 %v4412_v30 }
 0x6fc   :  { %v2757_v26 = vpop.f32.mrf.mxu1  ;;  %v2800_v31 = vpop.f32.mrf.mxu0 }
 0x6fd   :  { %v2818_v34 = vadd.f32 %v2812_v22, %v2757_v26  ;;  %v2846_v1 = vadd.f32 %v5249_v29, %v2800_v31 }
 0x6fe   :  { %v2759_v37 = vpop.f32.mrf.mxu1  ;;  %v4015_v39 = vpop.f32.mrf.mxu0 }
 0x6ff   :  { %v3604_v40 = vmul.f32 -1.442695, %v2818_v34  ;;  %v2832_v50 = vadd.f32 %v2813_v24, %v2759_v37  ;;  %v4238_v34 = vld [vmem:[%s5435_s5 + $0x30] sm:$0xff]   ;;  %v4239_v37 = vld [vmem:[%s5435_s5 + $0x28] sm:$0xff]   ;;  %v4240_v39 = vld [vmem:[%s5435_s5 + $0x20] sm:$0xff]  }
 0x700   :  { %v2761_v57 = vpop.f32.mrf.mxu1  ;;  %v2803_v5 = vpop.f32.mrf.mxu0 }
 0x701   :  { %4365 = vpow2.f32 %v3604_v40  ;;  %v2819_v42 = vadd.f32 %v2815_v35, %v2761_v57  ;;  %v3606_v55 = vmul.f32 -1.442695, %v2832_v50  ;;  %v2847_v61 = vadd.f32 %v5249_v29, %v2803_v5  ;;  %v4241_v40 = vld [vmem:[%s5435_s5 + $0x18] sm:$0xff]   ;;  %v4242_v35 = vld [vmem:[%s5435_s5 + $0x10] sm:$0xff]   ;;  %v4243_v57 = vld [vmem:[%s5435_s5 + $0x8] sm:$0xff]  }
 0x702   :  { %v4016_v44 = vpop.f32.mrf.mxu0  ;;  %v2763_v51 = vpop.f32.mrf.mxu1  ;;  %v4244_v5 = vld [vmem:[%s5435_s5] sm:$0xff]  }
 0x703   :  { %v3605_v48 = vmul.f32 -1.442695, %v2819_v42  ;;  %v2833_v52 = vadd.f32 %v2816_v46, %v2763_v51  ;;  %v3120_v42 = vld [vmem:[#allocation4 + $0xa8] sm:$0xff]  ;;  %v3122_v51 = vld [vmem:[#allocation4 + $0xb4] sm:$0xff] }
 0x704   :  { %v3124_v44 = vunpack.c.l.bf16 %v3120_v42 }
 0x705   :  { %4367 = vpow2.f32 %v3605_v48  ;;  %v3607_v8 = vmul.f32 -1.442695, %v2833_v52 }
 0x706   :  { %4369 = vpow2.f32 %v3606_v55 }
 0x707   :  { %4371 = vpow2.f32 %v3607_v8  ;;  %v3127_v8 = vunpack.c.l.bf16 %v3122_v51 }
 0x70e   :  { %v4366_v13 = vpop.eup %4365 }
 0x70f   :  { %v2826_v14 = vadd.f32 1.0, %v4366_v13 }
 0x711   :  { %4373 = vrcp.f32 %v2826_v14 }
 0x712   :  { %v4368_v16 = vpop.eup %4367 }
 0x713   :  { %v2827_v21 = vadd.f32 1.0, %v4368_v16  ;;  %v4370_v23 = vpop.eup %4369  ;;  %v3125_v16 = vunpack.c.h.bf16 %v3120_v42 }
 0x714   :  { %v4372_v25 = vpop.eup %4371  ;;  %v2840_v28 = vadd.f32 1.0, %v4370_v23 }
 0x715   :  { %4375 = vrcp.f32 %v2827_v21  ;;  %v2841_v54 = vadd.f32 1.0, %v4372_v25 }
 0x716   :  { %4377 = vrcp.f32 %v2840_v28 }
 0x717   :  { %4379 = vrcp.f32 %v2841_v54 }
 0x71e   :  { %v4374_v36 = vpop.eup %4373 }
 0x71f   :  { %v2848_v58 = vmul.f32 %v4374_v36, %v2846_v1  ;;  %v3128_v1 = vunpack.c.h.bf16 %v3122_v51 }
 0x721   :  { %v2850_v59 = vadd.f32 %v2848_v58, %v2814_v56 }
 0x722   :  { %v4376_v0 = vpop.eup %4375 }
 0x723   :  { %4381 = vtanh.f32 %v2850_v59  ;;  %v2849_v2 = vmul.f32 %v4376_v0, %v2847_v61  ;;  %v4378_v3 = vpop.eup %4377 }
 0x724   :  { %v4380_v4 = vpop.eup %4379  ;;  %v2854_v7 = vsub.f32 1.0, %v4378_v3  ;;  %v2858_v45 = vmul.f32 %v4378_v3, %v5255_v17 }
 0x725   :  { %v2851_v19 = vadd.f32 %v2849_v2, %v2817_v60  ;;  %v2855_v49 = vsub.f32 1.0, %v4380_v4  ;;  %v2859_v10 = vmul.f32 %v4380_v4, %v5257_v20 }
 0x727   :  { %4383 = vtanh.f32 %v2851_v19  ;;  %v3121_v19 = vld [vmem:[#allocation4 + $0xb0] ss:$12 sps:$4 sm:$0xff]  }
 0x730   :  { %v4382_v32 = vpop.eup %4381 }
 0x731   :  { %v2856_v53 = vmul.f32 %v4382_v32, %v2854_v7  ;;  %v3126_v7 = vunpack.c.l.bf16 %v3121_v19 }
 0x733   :  { %v5351_v22 = vadd.f32 %v2858_v45, %v2856_v53  ;;  %v3129_v45 = vunpack.c.h.bf16 %v3121_v19 }
 0x734   :  { %v4384_v9 = vpop.eup %4383 }
 0x735   :  { %v2857_v15 = vmul.f32 %v4384_v9, %v2855_v49 }
 0x737   :  { %v5353_v26 = vadd.f32 %v2859_v10, %v2857_v15 }
 0x739   :  { %v2862_v31 = vpack.c.bf16 %v5353_v26, %v5351_v22 }
 0x73b   :  { %3746 = vst [vmem:[%s5434_s7 + $0x30] sm:$0xff] %v2862_v31   ;;  %3068 = vmatmul.mubr.bf16.vlgmr.msra.gmra.mxu1 %v2862_v31  ;;  %4034 = vmatmul.mubr.bf16.vlgmr.msra.gmra.mxu0 %v2862_v31 }
 0x73c   :  { %4053 = vmatprep.mubr.msk.bf16.mxu1 %vm4414_vm0, %v4412_v30  ;;  %4038 = vmatpush3.bf16.msra.mxu1 %v4237_v33  ;;  %v1313_v33 = vadd.f32 %v4910_v38, %v4833_v62 }
 0x73d   :  { %4039 = vmatprep.subr.bf16.mxu1 %v4412_v30 }
 0x740   :  { %4040 = vmatpush3.bf16.msra.mxu1 %v4238_v34 }
 0x741   :  { %4041 = vmatprep.subr.bf16.mxu1 %v4412_v30 }
 0x744   :  { %4042 = vmatpush3.bf16.msra.mxu1 %v4239_v37  ;;  %v1314_v37 = vadd.f32 %v4912_v41, %v4835_v63 }
 0x745   :  { %4043 = vmatprep.subr.bf16.mxu1 %v4412_v30 }
 0x748   :  { %4044 = vmatpush3.bf16.msra.mxu1 %v4240_v39  ;;  %v1625_v39 = vadd.f32 %v5059_v11, %v1313_v33 }
 0x749   :  { %4045 = vmatprep.subr.bf16.mxu1 %v4412_v30 }
 0x74c   :  { %4046 = vmatpush3.bf16.msra.mxu1 %v4241_v40 }
 0x74d   :  { %4047 = vmatprep.subr.bf16.mxu1 %v4412_v30 }
 0x750   :  { %4048 = vmatpush3.bf16.msra.mxu1 %v4242_v35  ;;  %v1626_v35 = vadd.f32 %v5061_v12, %v1314_v37 }
 0x751   :  { %4049 = vmatprep.subr.bf16.mxu1 %v4412_v30 }
 0x752   :  { %v1938_v42 = vadd.f32 %v5125_v43, %v1626_v35 }
 0x754   :  { %4050 = vmatpush3.bf16.msra.mxu1 %v4243_v57  ;;  %v2250_v38 = vadd.f32 %v5189_v47, %v1938_v42 }
 0x755   :  { %4051 = vmatprep.subr.bf16.mxu1 %v4412_v30 }
 0x756   :  { %v2562_v12 = vadd.f32 %v5257_v20, %v2250_v38 }
 0x758   :  { %4052 = vmatpush3.bf16.msra.mxu1 %v4244_v5  ;;  %v2874_v43 = vadd.f32 %v5353_v26, %v2562_v12 }
 0x7fb   :  { %v3069_v24 = vpop.f32.mrf.mxu1  ;;  %v3112_v48 = vpop.f32.mrf.mxu0 }
 0x7fc   :  { %v3130_v46 = vadd.f32 %v3124_v44, %v3069_v24  ;;  %v3158_v3 = vadd.f32 %v5249_v29, %v3112_v48 }
 0x7fd   :  { %v3071_v50 = vpop.f32.mrf.mxu1  ;;  %v4035_v52 = vpop.f32.mrf.mxu0 }
 0x7fe   :  { %v3636_v55 = vmul.f32 -1.442695, %v3130_v46  ;;  %v3144_v25 = vadd.f32 %v3125_v16, %v3071_v50 }
 0x7ff   :  { %v3073_v13 = vpop.f32.mrf.mxu1  ;;  %v3115_v14 = vpop.f32.mrf.mxu0 }
 0x800   :  { %4385 = vpow2.f32 %v3636_v55  ;;  %v3131_v21 = vadd.f32 %v3127_v8, %v3073_v13  ;;  %v3638_v36 = vmul.f32 -1.442695, %v3144_v25  ;;  %v3159_v9 = vadd.f32 %v5249_v29, %v3115_v14 }
 0x801   :  { %v4036_v23 = vpop.f32.mrf.mxu0  ;;  %v3075_v30 = vpop.f32.mrf.mxu1  ;;  %v1937_v29 = vadd.f32 %v5123_v6, %v1625_v39 }
 0x802   :  { %v3637_v27 = vmul.f32 -1.442695, %v3131_v21  ;;  %v3145_v28 = vadd.f32 %v3128_v1, %v3075_v30 }
 0x803   :  { %v2249_v44 = vadd.f32 %v5187_v18, %v1937_v29 }
 0x804   :  { %4387 = vpow2.f32 %v3637_v27  ;;  %v3639_v54 = vmul.f32 -1.442695, %v3145_v28 }
 0x805   :  { %4389 = vpow2.f32 %v3638_v36  ;;  %v2561_v63 = vadd.f32 %v5255_v17, %v2249_v44 }
 0x806   :  { %4391 = vpow2.f32 %v3639_v54 }
 0x807   :  { %v2873_v6 = vadd.f32 %v5351_v22, %v2561_v63 }
 0x80d   :  { %v4386_v56 = vpop.eup %4385 }
 0x80e   :  { %v3138_v58 = vadd.f32 1.0, %v4386_v56 }
 0x810   :  { %4393 = vrcp.f32 %v3138_v58 }
 0x811   :  { %v4388_v59 = vpop.eup %4387 }
 0x812   :  { %v3139_v61 = vadd.f32 1.0, %v4388_v59  ;;  %v4390_v0 = vpop.eup %4389 }
 0x813   :  { %v4392_v60 = vpop.eup %4391  ;;  %v3152_v2 = vadd.f32 1.0, %v4390_v0 }
 0x814   :  { %4395 = vrcp.f32 %v3139_v61  ;;  %v3153_v32 = vadd.f32 1.0, %v4392_v60 }
 0x815   :  { %4397 = vrcp.f32 %v3152_v2 }
 0x816   :  { %4399 = vrcp.f32 %v3153_v32 }
 0x81d   :  { %v4394_v4 = vpop.eup %4393 }
 0x81e   :  { %v3160_v49 = vmul.f32 %v4394_v4, %v3158_v3 }
 0x820   :  { %v3162_v53 = vadd.f32 %v3160_v49, %v3126_v7 }
 0x821   :  { %v4396_v15 = vpop.eup %4395 }
 0x822   :  { %4401 = vtanh.f32 %v3162_v53  ;;  %v3161_v10 = vmul.f32 %v4396_v15, %v3159_v9  ;;  %v4398_v34 = vpop.eup %4397 }
 0x823   :  { %v4400_v40 = vpop.eup %4399  ;;  %v3166_v57 = vsub.f32 1.0, %v4398_v34  ;;  %v3170_v62 = vmul.f32 %v4398_v34, %v5351_v22 }
 0x824   :  { %v3163_v31 = vadd.f32 %v3161_v10, %v3129_v45  ;;  %v3167_v41 = vsub.f32 1.0, %v4400_v40  ;;  %v3171_v46 = vmul.f32 %v4400_v40, %v5353_v26  ;;  %v3644_v26 = vld [vmem:[%s5437_s6] ss:$0 sm:$0xff] }
 0x826   :  { %4403 = vtanh.f32 %v3163_v31 }
 0x82f   :  { %v4402_v5 = vpop.eup %4401 }
 0x830   :  { %v3168_v24 = vmul.f32 %v4402_v5, %v3166_v57 }
 0x832   :  { %v3172_v11 = vadd.f32 %v3170_v62, %v3168_v24 }
 0x833   :  { %v4404_v48 = vpop.eup %4403 }
 0x834   :  { %v3169_v51 = vmul.f32 %v4404_v48, %v3167_v41  ;;  %3194 = vst [vmem:[%s5436_s8] sm:$0xff] %v3172_v11  ;;  %v3185_v47 = vadd.f32 %v3172_v11, %v2873_v6 }
 0x836   :  { %v3173_v18 = vadd.f32 %v3171_v46, %v3169_v51  ;;  %v3196_v20 = vmul.f32 0.125, %v3185_v47 }
 0x838   :  { %v3739_v50 = vpack.c.bf16 %v3173_v18, %v3172_v11  ;;  %v3186_v17 = vadd.f32 %v3173_v18, %v2874_v43  ;;  %3195 = vst [vmem:[%s5436_s8 + $0x8] sm:$0xff] %v3173_v18 }
 0x83a   :  { %3747 = vst [vmem:[%s5434_s7 + $0x38] sm:$0xff] %v3739_v50   ;;  %v3197_v22 = vmul.f32 0.125, %v3186_v17 }
 0x83c   :  { %v3198_v52 = vpack.c.bf16 %v3197_v22, %v3196_v20 }
 0x83e   :  { %4054 = vmatmul.mubr.bf16.vlgmr.msra.gmra.mxu1 %v3198_v52 }
 0x8fe   :  { %v3304_v55 = vpop.f32.mrf.mxu1 }
 0x8ff   :  { %v3305_v8 = vadd.f32 %v3644_v26, %v3304_v55 }
 0x900   :  { %v4055_v13 = vpop.f32.mrf.mxu1 }
 0x901   :  { %3311 = vst [vmem:[%s5438_s9] sm:$0xff] %v3305_v8 }
 0x902   :  { %v3307_v14 = vpop.f32.mrf.mxu1 }
 0x903   :  { %v3308_v16 = vadd.f32 %v3644_v26, %v3307_v14 }
 0x904   :  { %v4056_v21 = vpop.f32.mrf.mxu1 }
 0x905   :  { %3312 = vst [vmem:[%s5438_s9 + $0x8] sm:$0xff] %v3308_v16 }

</bundles_post_ra>
